<compile_context>
chip_gen: v7x
topology: tpu7x:2x2x1
jax: 0.10.0
libtpu: 0.0.40
codegen_flags: <defaults>
</compile_context>

<pallas_src>
import jax
import jax.numpy as jnp
from jax import lax
from jax.experimental import pallas as pl
from jax.experimental.pallas import tpu as pltpu

NEG_SLOPE = 0.01  # nn.LeakyReLU default


def _leaky(x):
    return jnp.where(x > 0, x, NEG_SLOPE * x)


def classifier_kernel(index_ref, patches_ref, wcb_ref, w11_ref, b1c_ref,
                      w2_ref, b2_ref, w3_ref, b3_ref, out_ref):
    # index_ref   : (Bt, 1)        scalar index per row
    # patches_ref : (Bt, 48, 256)  im2col of padded state, k = ci*16 + kh*4 + kw
    # wcb_ref     : (3, 48, 256)   conv weight, lane-broadcast along spatial
    # w11_ref     : (1, 768)       Linear(1,768) weight (c*256 + spatial order)
    # b1c_ref     : (1, 768)       b11 + conv bias (repeated per channel), fused
    # w2_ref      : (768, 128)     Linear(768,100).T zero-padded to 128 cols
    # b2_ref      : (1, 128)       b2 zero-padded
    # w3_ref      : (128, 128)     Linear(100,10).T zero-padded (rows>=100 zero)
    # b3_ref      : (1, 128)       b3, padded lanes set to -1e30 (softmax mask)
    # out_ref     : (Bt, 128)      softmax probabilities (cols >= 10 are ~0)
    patches = patches_ref[...]                                   # (Bt, 48, 256)

    # Conv2d(3->3, k=4, s=2, p=1): per-output-channel contraction over k=48,
    # batched over the whole tile (VPU multiply + sublane reduce).
    convs = []
    for c in range(3):                                           # static, 3 iters
        convs.append(jnp.sum(patches * wcb_ref[c], axis=1))      # (Bt, 256)
    conv = jnp.concatenate(convs, axis=-1)                       # (Bt, 768) lane-dense

    # Linear(1, 768) on the scalar index + fused biases, then LeakyReLU.
    out1 = index_ref[...] * w11_ref[...]                         # (Bt,1)*(1,768)
    z = _leaky(conv + out1 + b1c_ref[...])                       # (Bt, 768)

    # Linear(768, 100 -> padded 128): one MXU matmul with M = Bt.
    h = jnp.dot(z, w2_ref[...], preferred_element_type=jnp.float32) + b2_ref[...]
    h = _leaky(h)                                                # (Bt, 128)

    # Linear(100, 10 -> padded 128) + masked softmax over 128 lanes.
    logits = jnp.dot(h, w3_ref[...],
                     preferred_element_type=jnp.float32) + b3_ref[...]  # (Bt, 128)
    m = jnp.max(logits, axis=-1, keepdims=True)
    e = jnp.exp(logits - m)                                      # padded lanes -> 0
    s = jnp.sum(e, axis=-1, keepdims=True)
    out_ref[...] = e * pl.reciprocal(s, approx=True)


def classifier_forward(index, state, params):
    B = state.shape[0]

    # Batch tiling: tile size (multiple of 8), capped so double-buffered f32
    # patches (Bt*48*256*4 B each) stay far below the scoped-VMEM default.
    Bt = min(64, max(8, ((B + 7) // 8) * 8))
    B_pad = ((B + Bt - 1) // Bt) * Bt
    n_blocks = B_pad // Bt

    # --- glue: im2col of the (padded) NCHW state --------------------------
    xp = jnp.pad(state, ((0, 0), (0, 0), (1, 1), (1, 1)))        # (B,3,34,34)
    cols = []
    for kh in range(4):
        for kw in range(4):
            cols.append(xp[:, :, kh:kh + 32:2, kw:kw + 32:2])    # (B,3,16,16)
    patches = jnp.stack(cols, axis=2)                            # (B,3,16,16,16)
    patches = patches.reshape(B, 48, 256)                        # k = ci*16+kh*4+kw
    patches = jnp.pad(patches, ((0, B_pad - B), (0, 0), (0, 0)))

    index2d = jnp.pad(index.reshape(B, 1).astype(jnp.float32),
                      ((0, B_pad - B), (0, 0)))                  # (B_pad, 1)

    # --- glue: reshape / pad parameters into kernel layouts ---------------
    f32 = jnp.float32
    wcb = jnp.broadcast_to(params["conv_w"].reshape(3, 48, 1).astype(f32),
                           (3, 48, 256))                         # (3,48,256)
    w11 = params["w11"].reshape(1, 768).astype(f32)              # (1,768)
    b1c = (params["b11"] + jnp.repeat(params["conv_b"], 256)
           ).reshape(1, 768).astype(f32)                         # fused biases
    w2p = jnp.zeros((768, 128), f32).at[:, :100].set(params["w2"].T)
    b2p = jnp.zeros((1, 128), f32).at[0, :100].set(params["b2"])
    w3p = jnp.zeros((128, 128), f32).at[:100, :10].set(params["w3"].T)
    b3p = jnp.full((1, 128), -1e30, f32).at[0, :10].set(params["b3"])

    weight_spec = lambda shape: pl.BlockSpec(shape, lambda i: (0,) * len(shape))

    out = pl.pallas_call(
        classifier_kernel,
        out_shape=jax.ShapeDtypeStruct((B_pad, 128), jnp.float32),
        grid=(n_blocks,),
        in_specs=[
            pl.BlockSpec((Bt, 1), lambda i: (i, 0)),             # index
            pl.BlockSpec((Bt, 48, 256), lambda i: (i, 0, 0)),    # patches
            weight_spec((3, 48, 256)),                           # wcb
            weight_spec((1, 768)),                               # w11
            weight_spec((1, 768)),                               # b1c
            weight_spec((768, 128)),                             # w2
            weight_spec((1, 128)),                               # b2
            weight_spec((128, 128)),                             # w3
            weight_spec((1, 128)),                               # b3
        ],
        out_specs=pl.BlockSpec((Bt, 128), lambda i: (i, 0)),
        compiler_params=pltpu.CompilerParams(
            dimension_semantics=("parallel",)),
    )(index2d, patches, wcb, w11, b1c, w2p, b2p, w3p, b3p)

    return out[:B, :10]


def init_params(key):
    # Deterministic, PyTorch-style uniform(-1/sqrt(fan_in), 1/sqrt(fan_in)).
    ks = jax.random.split(key, 8)

    def u(k, shape, fan_in):
        bound = 1.0 / (fan_in ** 0.5)
        return jax.random.uniform(k, shape, jnp.float32, -bound, bound)

    return {
        "w11": u(ks[0], (768, 1), 1),                 # layer1_1 = Linear(1, 768)
        "b11": u(ks[1], (768,), 1),
        "conv_w": u(ks[2], (3, 3, 4, 4), 3 * 4 * 4),  # layer1_2 = Conv2d(3,3,4,2,1)
        "conv_b": u(ks[3], (3,), 3 * 4 * 4),
        "w2": u(ks[4], (100, 768), 768),              # layer2 = Linear(768, 100)
        "b2": u(ks[5], (100,), 768),
        "w3": u(ks[6], (10, 100), 100),               # layer3 = Linear(100, 10)
        "b3": u(ks[7], (10,), 100),
    }


def reference(index, state, params):
    # Pure-JAX reference matching the PyTorch forward.
    idx = index.reshape(-1, 1)
    st = state.reshape(-1, 3, 32, 32)
    out1 = idx @ params["w11"].T + params["b11"]
    out2 = lax.conv_general_dilated(
        st, params["conv_w"], window_strides=(2, 2),
        padding=((1, 1), (1, 1)),
        dimension_numbers=("NCHW", "OIHW", "NCHW"))
    out2 = out2 + params["conv_b"][None, :, None, None]
    out2 = out2.reshape(-1, 768)
    out = out1 + out2
    out = jnp.where(out > 0, out, NEG_SLOPE * out)
    out = out @ params["w2"].T + params["b2"]
    out = jnp.where(out > 0, out, NEG_SLOPE * out)
    out = out @ params["w3"].T + params["b3"]
    return jax.nn.softmax(out, axis=1)


if __name__ == "__main__":
    key = jax.random.PRNGKey(0)
    kp, ki, ks = jax.random.split(key, 3)
    params = init_params(kp)

    B = 2
    index = jax.random.normal(ki, (B,), jnp.float32)
    state = jax.random.normal(ks, (B, 3, 32, 32), jnp.float32)

    out = classifier_forward(index, state, params)
    out = jax.block_until_ready(out)

    ref = reference(index, state, params)
    assert out.shape == (B, 10)
    assert jnp.allclose(out, ref, atol=2e-3, rtol=1e-2), (out, ref)
    print("KERNEL_OK")
</pallas_src>

<mosaic_0001>
module attributes {stable_mosaic.version = 11 : i64} {
  func.func @classifier_kernel(%arg0: i32, %arg1: memref<8x1xf32, #tpu.memory_space<vmem>>, %arg2: memref<8x48x256xf32, #tpu.memory_space<vmem>>, %arg3: memref<3x48x256xf32, #tpu.memory_space<vmem>>, %arg4: memref<1x768xf32, #tpu.memory_space<vmem>>, %arg5: memref<1x768xf32, #tpu.memory_space<vmem>>, %arg6: memref<768x128xf32, #tpu.memory_space<vmem>>, %arg7: memref<1x128xf32, #tpu.memory_space<vmem>>, %arg8: memref<128x128xf32, #tpu.memory_space<vmem>>, %arg9: memref<1x128xf32, #tpu.memory_space<vmem>>, %arg10: memref<8x128xf32, #tpu.memory_space<vmem>>) attributes {dimension_semantics = [#tpu.dimension_semantics<parallel>], iteration_bounds = array<i64: 1>, scalar_prefetch = 0 : i64, scratch_operands = 0 : i64, tpu.core_type = #tpu.core_type<tc>, window_params = [{transform_indices = @transform_0, window_bounds = array<i64: 8, 1>}, {transform_indices = @transform_1, window_bounds = array<i64: 8, 48, 256>}, {pipeline_mode = #tpu.pipeline_mode<synchronous>, transform_indices = @transform_2, window_bounds = array<i64: 3, 48, 256>}, {pipeline_mode = #tpu.pipeline_mode<synchronous>, transform_indices = @transform_3, window_bounds = array<i64: 1, 768>}, {pipeline_mode = #tpu.pipeline_mode<synchronous>, transform_indices = @transform_4, window_bounds = array<i64: 1, 768>}, {pipeline_mode = #tpu.pipeline_mode<synchronous>, transform_indices = @transform_5, window_bounds = array<i64: 768, 128>}, {pipeline_mode = #tpu.pipeline_mode<synchronous>, transform_indices = @transform_6, window_bounds = array<i64: 1, 128>}, {pipeline_mode = #tpu.pipeline_mode<synchronous>, transform_indices = @transform_7, window_bounds = array<i64: 128, 128>}, {pipeline_mode = #tpu.pipeline_mode<synchronous>, transform_indices = @transform_8, window_bounds = array<i64: 1, 128>}, {transform_indices = @transform_9, window_bounds = array<i64: 8, 128>}]} {
    %c0 = arith.constant 0 : index
    %c0_0 = arith.constant 0 : index
    %c0_1 = arith.constant 0 : index
    %0 = vector.load %arg2[%c0, %c0_0, %c0_1] : memref<8x48x256xf32, #tpu.memory_space<vmem>>, vector<8x48x256xf32>
    %c0_2 = arith.constant 0 : index
    %c0_3 = arith.constant 0 : index
    %c0_4 = arith.constant 0 : index
    %1 = vector.load %arg3[%c0_2, %c0_3, %c0_4] : memref<3x48x256xf32, #tpu.memory_space<vmem>>, vector<1x48x256xf32>
    %2 = vector.shape_cast %1 : vector<1x48x256xf32> to vector<48x256xf32>
    %3 = vector.shape_cast %2 : vector<48x256xf32> to vector<1x48x256xf32>
    %4 = vector.broadcast %3 : vector<1x48x256xf32> to vector<8x48x256xf32>
    %5 = arith.mulf %0, %4 : vector<8x48x256xf32>
    %cst = arith.constant dense<0.000000e+00> : vector<8x256xf32>
    %6 = vector.multi_reduction <add>, %5, %cst [1] : vector<8x48x256xf32> to vector<8x256xf32>
    %c1 = arith.constant 1 : index
    %c0_5 = arith.constant 0 : index
    %c0_6 = arith.constant 0 : index
    %7 = vector.load %arg3[%c1, %c0_5, %c0_6] : memref<3x48x256xf32, #tpu.memory_space<vmem>>, vector<1x48x256xf32>
    %8 = vector.shape_cast %7 : vector<1x48x256xf32> to vector<48x256xf32>
    %9 = vector.shape_cast %8 : vector<48x256xf32> to vector<1x48x256xf32>
    %10 = vector.broadcast %9 : vector<1x48x256xf32> to vector<8x48x256xf32>
    %11 = arith.mulf %0, %10 : vector<8x48x256xf32>
    %cst_7 = arith.constant dense<0.000000e+00> : vector<8x256xf32>
    %12 = vector.multi_reduction <add>, %11, %cst_7 [1] : vector<8x48x256xf32> to vector<8x256xf32>
    %c2 = arith.constant 2 : index
    %c0_8 = arith.constant 0 : index
    %c0_9 = arith.constant 0 : index
    %13 = vector.load %arg3[%c2, %c0_8, %c0_9] : memref<3x48x256xf32, #tpu.memory_space<vmem>>, vector<1x48x256xf32>
    %14 = vector.shape_cast %13 : vector<1x48x256xf32> to vector<48x256xf32>
    %15 = vector.shape_cast %14 : vector<48x256xf32> to vector<1x48x256xf32>
    %16 = vector.broadcast %15 : vector<1x48x256xf32> to vector<8x48x256xf32>
    %17 = arith.mulf %0, %16 : vector<8x48x256xf32>
    %cst_10 = arith.constant dense<0.000000e+00> : vector<8x256xf32>
    %18 = vector.multi_reduction <add>, %17, %cst_10 [1] : vector<8x48x256xf32> to vector<8x256xf32>
    %19 = tpu.concatenate %6, %12, %18 in 1 : vector<8x256xf32>, vector<8x256xf32>, vector<8x256xf32> -> vector<8x768xf32>
    %c0_11 = arith.constant 0 : index
    %c0_12 = arith.constant 0 : index
    %20 = vector.load %arg1[%c0_11, %c0_12] : memref<8x1xf32, #tpu.memory_space<vmem>>, vector<8x1xf32>
    %c0_13 = arith.constant 0 : index
    %c0_14 = arith.constant 0 : index
    %21 = vector.load %arg4[%c0_13, %c0_14] : memref<1x768xf32, #tpu.memory_space<vmem>>, vector<1x768xf32>
    %22 = vector.broadcast %20 : vector<8x1xf32> to vector<8x768xf32>
    %23 = vector.broadcast %21 : vector<1x768xf32> to vector<8x768xf32>
    %24 = arith.mulf %22, %23 : vector<8x768xf32>
    %25 = arith.addf %19, %24 : vector<8x768xf32>
    %c0_15 = arith.constant 0 : index
    %c0_16 = arith.constant 0 : index
    %26 = vector.load %arg5[%c0_15, %c0_16] : memref<1x768xf32, #tpu.memory_space<vmem>>, vector<1x768xf32>
    %27 = vector.broadcast %26 : vector<1x768xf32> to vector<8x768xf32>
    %28 = arith.addf %25, %27 : vector<8x768xf32>
    %cst_17 = arith.constant 0.000000e+00 : f32
    %29 = vector.broadcast %cst_17 : f32 to vector<8x768xf32>
    %30 = arith.cmpf ogt, %28, %29 : vector<8x768xf32>
    %cst_18 = arith.constant 0.00999999977 : f32
    %31 = vector.broadcast %cst_18 : f32 to vector<8x768xf32>
    %32 = arith.mulf %31, %28 : vector<8x768xf32>
    %33 = arith.select %30, %28, %32 : vector<8x768xi1>, vector<8x768xf32>
    %c0_19 = arith.constant 0 : index
    %c0_20 = arith.constant 0 : index
    %34 = vector.load %arg6[%c0_19, %c0_20] : memref<768x128xf32, #tpu.memory_space<vmem>>, vector<768x128xf32>
    %cst_21 = arith.constant dense<0.000000e+00> : vector<8x128xf32>
    %35 = tpu.matmul %33, %34, %cst_21 {dimension_numbers = #tpu.dot_dimension_numbers<[1], [0], [0], [1], [0, 0, 1, 1], [], []>} : vector<8x768xf32>, vector<768x128xf32>, vector<8x128xf32> -> vector<8x128xf32>
    %c0_22 = arith.constant 0 : index
    %c0_23 = arith.constant 0 : index
    %36 = vector.load %arg7[%c0_22, %c0_23] : memref<1x128xf32, #tpu.memory_space<vmem>>, vector<1x128xf32>
    %37 = vector.broadcast %36 : vector<1x128xf32> to vector<8x128xf32>
    %38 = arith.addf %35, %37 : vector<8x128xf32>
    %cst_24 = arith.constant 0.000000e+00 : f32
    %39 = vector.broadcast %cst_24 : f32 to vector<8x128xf32>
    %40 = arith.cmpf ogt, %38, %39 : vector<8x128xf32>
    %cst_25 = arith.constant 0.00999999977 : f32
    %41 = vector.broadcast %cst_25 : f32 to vector<8x128xf32>
    %42 = arith.mulf %41, %38 : vector<8x128xf32>
    %43 = arith.select %40, %38, %42 : vector<8x128xi1>, vector<8x128xf32>
    %c0_26 = arith.constant 0 : index
    %c0_27 = arith.constant 0 : index
    %44 = vector.load %arg8[%c0_26, %c0_27] : memref<128x128xf32, #tpu.memory_space<vmem>>, vector<128x128xf32>
    %cst_28 = arith.constant dense<0.000000e+00> : vector<8x128xf32>
    %45 = tpu.matmul %43, %44, %cst_28 {dimension_numbers = #tpu.dot_dimension_numbers<[1], [0], [0], [1], [0, 0, 1, 1], [], []>} : vector<8x128xf32>, vector<128x128xf32>, vector<8x128xf32> -> vector<8x128xf32>
    %c0_29 = arith.constant 0 : index
    %c0_30 = arith.constant 0 : index
    %46 = vector.load %arg9[%c0_29, %c0_30] : memref<1x128xf32, #tpu.memory_space<vmem>>, vector<1x128xf32>
    %47 = vector.broadcast %46 : vector<1x128xf32> to vector<8x128xf32>
    %48 = arith.addf %45, %47 : vector<8x128xf32>
    %cst_31 = arith.constant dense<0xFF800000> : vector<8xf32>
    %49 = vector.multi_reduction <maximumf>, %48, %cst_31 [1] : vector<8x128xf32> to vector<8xf32>
    %50 = vector.shape_cast %49 : vector<8xf32> to vector<8x1xf32>
    %51 = vector.broadcast %50 : vector<8x1xf32> to vector<8x128xf32>
    %52 = arith.subf %48, %51 : vector<8x128xf32>
    %53 = math.exp %52 : vector<8x128xf32>
    %cst_32 = arith.constant dense<0.000000e+00> : vector<8xf32>
    %54 = vector.multi_reduction <add>, %53, %cst_32 [1] : vector<8x128xf32> to vector<8xf32>
    %55 = vector.shape_cast %54 : vector<8xf32> to vector<8x1xf32>
    %56 = tpu.reciprocal %55 {approx = true} : vector<8x1xf32> -> vector<8x1xf32>
    %57 = vector.broadcast %56 : vector<8x1xf32> to vector<8x128xf32>
    %58 = arith.mulf %53, %57 : vector<8x128xf32>
    %c0_33 = arith.constant 0 : index
    %c0_34 = arith.constant 0 : index
    %59 = vector.load %arg10[%c0_33, %c0_34] : memref<8x128xf32, #tpu.memory_space<vmem>>, vector<8x128xf32>
    tpu.vector_store %arg10[%c0_33, %c0_34], %58 {strides = array<i32>} : memref<8x128xf32, #tpu.memory_space<vmem>>, vector<8x128xf32>,
    return
  }
  func.func @transform_0(%arg0: i32) -> (i32, i32) {
    %c0_i32 = arith.constant 0 : i32
    %c0_i32_0 = arith.constant 0 : i32
    return %arg0, %c0_i32 : i32, i32
  }
  func.func @transform_1(%arg0: i32) -> (i32, i32, i32) {
    %c0_i32 = arith.constant 0 : i32
    %c0_i32_0 = arith.constant 0 : i32
    %c0_i32_1 = arith.constant 0 : i32
    return %arg0, %c0_i32, %c0_i32_0 : i32, i32, i32
  }
  func.func @transform_2(%arg0: i32) -> (i32, i32, i32) {
    %c0_i32 = arith.constant 0 : i32
    %c0_i32_0 = arith.constant 0 : i32
    %c0_i32_1 = arith.constant 0 : i32
    %c0_i32_2 = arith.constant 0 : i32
    return %c0_i32, %c0_i32_0, %c0_i32_1 : i32, i32, i32
  }
  func.func @transform_3(%arg0: i32) -> (i32, i32) {
    %c0_i32 = arith.constant 0 : i32
    %c0_i32_0 = arith.constant 0 : i32
    %c0_i32_1 = arith.constant 0 : i32
    return %c0_i32, %c0_i32_0 : i32, i32
  }
  func.func @transform_4(%arg0: i32) -> (i32, i32) {
    %c0_i32 = arith.constant 0 : i32
    %c0_i32_0 = arith.constant 0 : i32
    %c0_i32_1 = arith.constant 0 : i32
    return %c0_i32, %c0_i32_0 : i32, i32
  }
  func.func @transform_5(%arg0: i32) -> (i32, i32) {
    %c0_i32 = arith.constant 0 : i32
    %c0_i32_0 = arith.constant 0 : i32
    %c0_i32_1 = arith.constant 0 : i32
    return %c0_i32, %c0_i32_0 : i32, i32
  }
  func.func @transform_6(%arg0: i32) -> (i32, i32) {
    %c0_i32 = arith.constant 0 : i32
    %c0_i32_0 = arith.constant 0 : i32
    %c0_i32_1 = arith.constant 0 : i32
    return %c0_i32, %c0_i32_0 : i32, i32
  }
  func.func @transform_7(%arg0: i32) -> (i32, i32) {
    %c0_i32 = arith.constant 0 : i32
    %c0_i32_0 = arith.constant 0 : i32
    %c0_i32_1 = arith.constant 0 : i32
    return %c0_i32, %c0_i32_0 : i32, i32
  }
  func.func @transform_8(%arg0: i32) -> (i32, i32) {
    %c0_i32 = arith.constant 0 : i32
    %c0_i32_0 = arith.constant 0 : i32
    %c0_i32_1 = arith.constant 0 : i32
    return %c0_i32, %c0_i32_0 : i32, i32
  }
  func.func @transform_9(%arg0: i32) -> (i32, i32) {
    %c0_i32 = arith.constant 0 : i32
    %c0_i32_0 = arith.constant 0 : i32
    return %arg0, %c0_i32 : i32, i32
  }
}

</mosaic_0001>

<bundles_post_ra>
// kernel: tpu_custom_call.1
= control target key start
LH: loop header
LB: loop body
LE: loop exit
PB: predicated region body
PF: predicated region fallthrough
CT: control target
= control target key end

     0   :  { %14 = vsyncpa [#allocation3], 0  ;;  %s3586_s0 = inlined_call_operand.vmem [shape: f32[8,1], index: 0, kind: input, shape index: {}]   ;;  %s3587_s1 = inlined_call_operand.hbm [shape: f32[8,48,256], index: 1, kind: input, shape index: {}]   ;;  %s3588_s2 = inlined_call_operand.hbm [shape: f32[3,48,256], index: 2, kind: input, shape index: {}]   ;;  %s3589_s3 = inlined_call_operand.vmem [shape: f32[1,768], index: 3, kind: input, shape index: {}]   ;;  %s3590_s4 = inlined_call_operand.vmem [shape: f32[1,768], index: 4, kind: input, shape index: {}]   ;;  %s3591_s5 = inlined_call_operand.hbm [shape: f32[768,128], index: 5, kind: input, shape index: {}]   ;;  %s3592_s6 = inlined_call_operand.vmem [shape: f32[1,128], index: 6, kind: input, shape index: {}]   ;;  %s3593_s7 = inlined_call_operand.hbm [shape: f32[128,128], index: 7, kind: input, shape index: {}]   ;;  %s3594_s8 = inlined_call_operand.vmem [shape: f32[1,128], index: 8, kind: input, shape index: {}]   ;;  %s3595_s9 = inlined_call_operand.hbm [shape: f32[8,128], index: 9, kind: output, shape index: {}]  }
   0x1   :  { %15 = vsyncpa [#allocation6], 0 }
   0x2   :  { %16 = vsyncpa [#allocation9], 0 }
   0x3   :  { %17 = vsyncpa [#allocation4], 0  ;;  %s2196_s30 = smov [#allocation5]   ;;  %s2197_s11 = smov [#allocation2]  }
   0x4   :  { %s37_s10 = sshll.u32 %s2196_s30, 4  ;;  %s25_s12 = sshll.u32 %s2197_s11, 4  ;;  %s38_s10 = int_to_ptr.vmem [resolvable:$true] %s37_s10  ;;  %s2259_s12 = int_to_ptr.vmem [resolvable:$true] %s25_s12 }
   0x5   :  { %s2078_s15 = scalar_lea.hbm %s3588_s2, 4608 }
   0x6   :  { %p2079_p0 = scmp.ne.s32.totalorder %s3588_s2, %s2078_s15  ;;  %p2082_p1 = scmp.lt.u32.totalorder %s2078_s15, %s3588_s2 }
   0x8   :  { %p2084_p2 = pnand %p2082_p1, %p2079_p0 }
   0xa   :  { %2087 = shalt.err (!%p2084_p2)
}
   0xb   :  { %s2088_s20 = scalar_lea.vmem %s38_s10, 4608  ;;  %p2093_p4 = scmp.lt.s32.totalorder %s38_s10, %s38_s10 }
   0xc   :  { %p2089_p3 = scmp.ne.s32.totalorder %s38_s10, %s2088_s20  ;;  %p2094_p5 = scmp.lt.s32.totalorder %s2088_s20, %s2088_s20 }
   0xe   :  { %p2095_p6 = por %p2094_p5, %p2093_p4 }
  0x10   :  { %p2096_p7 = pnand %p2095_p6, %p2089_p3 }
  0x12   :  { %2099 = shalt.err (!%p2096_p7)
}
  0x13   :  { %s2198_s21 = smov 256   ;;  %s2199_s22 = smov 16  }
  0x14   :  { %43 = dma.hbm_to_vmem [thread:$0]  %s3588_s2, 4608, %s38_s10, [#allocation6], %s2198_s21, %s2198_s21, %s2199_s22  }
  0x15   :  { %s2100_s27 = scalar_lea.hbm %s3587_s1, 12288 }
  0x16   :  { %p2101_p8 = scmp.ne.s32.totalorder %s3587_s1, %s2100_s27  ;;  %p2104_p9 = scmp.lt.u32.totalorder %s2100_s27, %s3587_s1 }
  0x18   :  { %p2106_p10 = pnand %p2104_p9, %p2101_p8 }
  0x1a   :  { %2109 = shalt.err (!%p2106_p10)
}
  0x1b   :  { %s2110_s13 = scalar_lea.vmem %s2259_s12, 12288  ;;  %p2115_p12 = scmp.lt.s32.totalorder %s2259_s12, %s2259_s12 }
  0x1c   :  { %p2111_p11 = scmp.ne.s32.totalorder %s2259_s12, %s2110_s13  ;;  %p2116_p13 = scmp.lt.s32.totalorder %s2110_s13, %s2110_s13 }
  0x1e   :  { %p2117_p0 = por %p2116_p13, %p2115_p12 }
  0x20   :  { %p2118_p1 = pnand %p2117_p0, %p2111_p11 }
  0x22   :  { %2121 = shalt.err (!%p2118_p1)
}
  0x23   :  { %31 = dma.hbm_to_vmem [thread:$0]  %s3587_s1, 12288, %s2259_s12, [#allocation3], %s2198_s21, %s2198_s21, %s2199_s22  }
  0x24   :  { %s2200_s14 = smov [#allocation7]   ;;  %s2122_s18 = scalar_lea.hbm %s3591_s5, 12288 }
  0x25   :  { %s53_s15 = sshll.u32 %s2200_s14, 4  ;;  %p2123_p2 = scmp.ne.s32.totalorder %s3591_s5, %s2122_s18  ;;  %s54_s15 = int_to_ptr.vmem [resolvable:$true] %s53_s15 }
  0x26   :  { %p2126_p3 = scmp.lt.u32.totalorder %s2122_s18, %s3591_s5 }
  0x28   :  { %p2128_p4 = pnand %p2126_p3, %p2123_p2 }
  0x2a   :  { %2131 = shalt.err (!%p2128_p4)
}
  0x2b   :  { %s2132_s25 = scalar_lea.vmem %s54_s15, 12288  ;;  %p2137_p6 = scmp.lt.s32.totalorder %s54_s15, %s54_s15 }
  0x2c   :  { %p2133_p5 = scmp.ne.s32.totalorder %s54_s15, %s2132_s25  ;;  %p2138_p7 = scmp.lt.s32.totalorder %s2132_s25, %s2132_s25 }
  0x2e   :  { %p2139_p8 = por %p2138_p7, %p2137_p6 }
  0x30   :  { %p2140_p9 = pnand %p2139_p8, %p2133_p5 }
  0x32   :  { %2143 = shalt.err (!%p2140_p9)
}
  0x33   :  { %s2201_s1 = smov 128   ;;  %s2202_s12 = smov 8  }
  0x34   :  { %59 = dma.hbm_to_vmem [thread:$0]  %s3591_s5, 12288, %s54_s15, [#allocation6], %s2201_s1, %s2201_s1, %s2202_s12  }
  0x35   :  { %s2203_s26 = smov [#allocation8]   ;;  %s2144_s30 = scalar_lea.hbm %s3593_s7, 2048 }
  0x36   :  { %s67_s27 = sshll.u32 %s2203_s26, 4  ;;  %p2145_p10 = scmp.ne.s32.totalorder %s3593_s7, %s2144_s30  ;;  %s68_s27 = int_to_ptr.vmem [resolvable:$true] %s67_s27 }
  0x37   :  { %p2148_p11 = scmp.lt.u32.totalorder %s2144_s30, %s3593_s7 }
  0x39   :  { %p2150_p12 = pnand %p2148_p11, %p2145_p10 }
  0x3b   :  { %2153 = shalt.err (!%p2150_p12)
}
  0x3c   :  { %s2154_s14 = scalar_lea.vmem %s68_s27, 2048  ;;  %p2159_p0 = scmp.lt.s32.totalorder %s68_s27, %s68_s27 }
  0x3d   :  { %p2155_p13 = scmp.ne.s32.totalorder %s68_s27, %s2154_s14  ;;  %p2160_p1 = scmp.lt.s32.totalorder %s2154_s14, %s2154_s14 }
  0x3f   :  { %p2161_p2 = por %p2160_p1, %p2159_p0 }
  0x41   :  { %p2162_p3 = pnand %p2161_p2, %p2155_p13 }
  0x43   :  { %2165 = shalt.err (!%p2162_p3)
}
  0x44   :  { %73 = dma.hbm_to_vmem [thread:$0]  %s3593_s7, 2048, %s68_s27, [#allocation9], %s2201_s1, %s2201_s1, %s2202_s12  }
  0x45   :  { %2188 = dma.done.wait [#allocation3], 12288  }
  0x46   :  { %2189 = vsyncadd [#allocation3], 4294955008 }
  0x47   :  { %2190 = dma.done.wait [#allocation6], 16896  }
  0x48   :  { %2191 = vsyncadd [#allocation6], 4294950400 }
  0x49   :  { %2192 = dma.done.wait [#allocation9], 2048  }
  0x4a   :  { %2193 = vsyncadd [#allocation9], 4294965248  ;;  %v2204_v0 = vmov 0   ;;  %v1141_v1 = vld [vmem:[%s3586_s0] sm:$0xff]  ;;  %v1263_v2 = vld [vmem:[#allocation7 + $0x80] sm:$0xff]  ;;  %vm1054_vm0 = vcmask 1041409  }
  0x4b   :  { %1975 = vset.pattern.permute.xlu0 %v2204_v0  ;;  %v1264_v3 = vld [vmem:[#allocation7 + $0x88] sm:$0xff]  ;;  %v1247_v5 = vld [vmem:[#allocation7] sm:$0xff]  ;;  %v1265_v14 = vld [vmem:[#allocation7 + $0x90] sm:$0xff]  ;;  %vm1056_vm1 = vcmask 1042434   ;;  %vm1058_vm2 = vcmask 1043459   ;;  %vm1060_vm3 = vcmask 1044484  }
  0x4c   :  { %1145 = vperm.xlu0 %1975, %v1141_v1   ;;  %v1842_v4 = vpack.c.bf16 %v1264_v3, %v1263_v2  ;;  %v1248_v6 = vld [vmem:[#allocation7 + $0x8] sm:$0xff]  ;;  %v1295_v7 = vld [vmem:[#allocation7 + $0x180] sm:$0xff]  ;;  %v1266_v15 = vld [vmem:[#allocation7 + $0x98] sm:$0xff]  ;;  %vm1062_vm4 = vcmask 1045509   ;;  %vm1064_vm5 = vcmask 1046534   ;;  %vm1066_vm6 = vcmask 1047559  }
  0x4d   :  { %v1844_v8 = vpack.c.bf16 %v1248_v6, %v1247_v5  ;;  %v1296_v9 = vld [vmem:[#allocation7 + $0x188] sm:$0xff]  ;;  %v1279_v10 = vld [vmem:[#allocation7 + $0x100] sm:$0xff]  ;;  %v1249_v16 = vld [vmem:[#allocation7 + $0x10] sm:$0xff]  ;;  %v1846_v17 = vpack.c.bf16 %v1266_v15, %v1265_v14  ;;  %vm2206_vm13 = vmmov 0  }
  0x4e   :  { %v1280_v11 = vld [vmem:[#allocation7 + $0x108] sm:$0xff]  ;;  %1843 = vmatprep.subr.bf16.mxu0 %v1842_v4  ;;  %v1874_v12 = vpack.c.bf16 %v1296_v9, %v1295_v7  ;;  %v1250_v18 = vld [vmem:[#allocation7 + $0x18] sm:$0xff]  ;;  %v1297_v19 = vld [vmem:[#allocation7 + $0x190] sm:$0xff] }
  0x4f   :  { %v1876_v13 = vpack.c.bf16 %v1280_v11, %v1279_v10  ;;  %1845 = vmatpush3.bf16.msra.mxu0 %v1844_v8  ;;  %v1298_v20 = vld [vmem:[#allocation7 + $0x198] sm:$0xff]  ;;  %v1848_v21 = vpack.c.bf16 %v1250_v18, %v1249_v16  ;;  %v1281_v23 = vld [vmem:[#allocation7 + $0x110] sm:$0xff]  ;;  %v1267_v25 = vld [vmem:[#allocation7 + $0xa0] sm:$0xff] }
  0x50   :  { %1875 = vmatprep.subr.bf16.mxu1 %v1874_v12  ;;  %v1878_v22 = vpack.c.bf16 %v1298_v20, %v1297_v19  ;;  %v1282_v24 = vld [vmem:[#allocation7 + $0x118] sm:$0xff]  ;;  %1847 = vmatprep.subr.bf16.mxu0 %v1846_v17  ;;  %v1268_v27 = vld [vmem:[#allocation7 + $0xa8] sm:$0xff]  ;;  %v1251_v28 = vld [vmem:[#allocation7 + $0x20] sm:$0xff] }
  0x51   :  { %1877 = vmatpush3.bf16.msra.mxu1 %v1876_v13  ;;  %v1880_v26 = vpack.c.bf16 %v1282_v24, %v1281_v23  ;;  %v1252_v29 = vld [vmem:[#allocation7 + $0x28] sm:$0xff]  ;;  %v1850_v30 = vpack.c.bf16 %v1268_v27, %v1267_v25  ;;  %v1299_v31 = vld [vmem:[#allocation7 + $0x1a0] sm:$0xff]  ;;  %v1269_v37 = vld [vmem:[#allocation7 + $0xb0] sm:$0xff] }
  0x52   :  { %1879 = vmatprep.subr.bf16.mxu1 %v1878_v22  ;;  %v1300_v32 = vld [vmem:[#allocation7 + $0x1a8] sm:$0xff]  ;;  %v1283_v33 = vld [vmem:[#allocation7 + $0x120] sm:$0xff]  ;;  %v1852_v34 = vpack.c.bf16 %v1252_v29, %v1251_v28  ;;  %v1270_v38 = vld [vmem:[#allocation7 + $0xb8] sm:$0xff]  ;;  %v1149_v28 = vlaneseq }
  0x53   :  { %1849 = vmatpush3.bf16.msra.mxu0 %v1848_v21  ;;  %v1882_v35 = vpack.c.bf16 %v1300_v32, %v1299_v31  ;;  %v1284_v36 = vld [vmem:[#allocation7 + $0x128] sm:$0xff]  ;;  %v1854_v39 = vpack.c.bf16 %v1270_v38, %v1269_v37  ;;  %v1253_v40 = vld [vmem:[#allocation7 + $0x30] sm:$0xff]  ;;  %v1254_v41 = vld [vmem:[#allocation7 + $0x38] sm:$0xff] }
  0x54   :  { %1851 = vmatprep.subr.bf16.mxu0 %v1850_v30  ;;  %v1301_v42 = vld [vmem:[#allocation7 + $0x1b0] sm:$0xff]  ;;  %v1884_v43 = vpack.c.bf16 %v1284_v36, %v1283_v33  ;;  %v1302_v44 = vld [vmem:[#allocation7 + $0x1b8] sm:$0xff]  ;;  %v1271_v48 = vld [vmem:[#allocation7 + $0xc0] sm:$0xff]  ;;  %v1856_v50 = vpack.c.bf16 %v1254_v41, %v1253_v40 }
  0x55   :  { %1881 = vmatpush3.bf16.msra.mxu1 %v1880_v26  ;;  %v1285_v45 = vld [vmem:[#allocation7 + $0x130] sm:$0xff]  ;;  %v1886_v46 = vpack.c.bf16 %v1302_v44, %v1301_v42  ;;  %v1286_v47 = vld [vmem:[#allocation7 + $0x138] sm:$0xff]  ;;  %v1272_v49 = vld [vmem:[#allocation7 + $0xc8] sm:$0xff] }
  0x56   :  { %1883 = vmatprep.subr.bf16.mxu1 %v1882_v35  ;;  %v1303_v51 = vld [vmem:[#allocation7 + $0x1c0] sm:$0xff]  ;;  %v1304_v52 = vld [vmem:[#allocation7 + $0x1c8] sm:$0xff]  ;;  %v1858_v53 = vpack.c.bf16 %v1272_v49, %v1271_v48  ;;  %v1888_v56 = vpack.c.bf16 %v1286_v47, %v1285_v45  ;;  %v1273_v57 = vld [vmem:[#allocation7 + $0xd0] sm:$0xff] }
  0x57   :  { %1853 = vmatpush3.bf16.msra.mxu0 %v1852_v34  ;;  %v1255_v54 = vld [vmem:[#allocation7 + $0x40] sm:$0xff]  ;;  %v1256_v55 = vld [vmem:[#allocation7 + $0x48] sm:$0xff]  ;;  %v1274_v58 = vld [vmem:[#allocation7 + $0xd8] sm:$0xff]  ;;  %v1890_v59 = vpack.c.bf16 %v1304_v52, %v1303_v51  ;;  %v2317_v34 = vshrl.u32 %v1149_v28, 7 }
  0x58   :  { %1855 = vmatprep.subr.bf16.mxu0 %v1854_v39  ;;  %v1287_v60 = vld [vmem:[#allocation7 + $0x140] sm:$0xff]  ;;  %v1288_v61 = vld [vmem:[#allocation7 + $0x148] sm:$0xff]  ;;  %v1860_v62 = vpack.c.bf16 %v1256_v55, %v1255_v54  ;;  %v1305_v63 = vld [vmem:[#allocation7 + $0x1d0] sm:$0xff]  ;;  %v1862_v1 = vpack.c.bf16 %v1274_v58, %v1273_v57 }
  0x59   :  { %1885 = vmatpush3.bf16.msra.mxu1 %v1884_v43  ;;  %v1306_v0 = vld [vmem:[#allocation7 + $0x1d8] sm:$0xff]  ;;  %v1257_v2 = vld [vmem:[#allocation7 + $0x50] sm:$0xff]  ;;  %v1892_v4 = vpack.c.bf16 %v1288_v61, %v1287_v60  ;;  %v1275_v5 = vld [vmem:[#allocation7 + $0xe0] sm:$0xff]  ;;  %3705 = vst [vmem:[#allocation15_spill] sm:$0xff] %v2317_v34  ;;  %v3597_v40 = vsub.s32 1, %v2317_v34  ;;  %v3596_v41 = vsub.s32 3, %v2317_v34 }
  0x5a   :  { %1887 = vmatprep.subr.bf16.mxu1 %v1886_v46  ;;  %v1258_v3 = vld [vmem:[#allocation7 + $0x58] sm:$0xff]  ;;  %v1276_v6 = vld [vmem:[#allocation7 + $0xe8] sm:$0xff]  ;;  %v1894_v7 = vpack.c.bf16 %v1306_v0, %v1305_v63  ;;  %v1289_v8 = vld [vmem:[#allocation7 + $0x150] sm:$0xff] }
  0x5b   :  { %1857 = vmatpush3.bf16.msra.mxu0 %v1856_v50  ;;  %v1290_v9 = vld [vmem:[#allocation7 + $0x158] sm:$0xff]  ;;  %v1864_v10 = vpack.c.bf16 %v1258_v3, %v1257_v2  ;;  %v1307_v11 = vld [vmem:[#allocation7 + $0x1e0] sm:$0xff]  ;;  %v1308_v12 = vld [vmem:[#allocation7 + $0x1e8] sm:$0xff]  ;;  %v1866_v13 = vpack.c.bf16 %v1276_v6, %v1275_v5 }
  0x5c   :  { %1859 = vmatprep.subr.bf16.mxu0 %v1858_v53  ;;  %v1259_v14 = vld [vmem:[#allocation7 + $0x60] sm:$0xff]  ;;  %v1260_v15 = vld [vmem:[#allocation7 + $0x68] sm:$0xff]  ;;  %v1896_v16 = vpack.c.bf16 %v1290_v9, %v1289_v8  ;;  %v1277_v17 = vld [vmem:[#allocation7 + $0xf0] sm:$0xff]  ;;  %v1898_v19 = vpack.c.bf16 %v1308_v12, %v1307_v11 }
  0x5d   :  { %1889 = vmatpush3.bf16.msra.mxu1 %v1888_v56  ;;  %v1278_v18 = vld [vmem:[#allocation7 + $0xf8] sm:$0xff]  ;;  %v1291_v20 = vld [vmem:[#allocation7 + $0x160] sm:$0xff]  ;;  %v1292_v21 = vld [vmem:[#allocation7 + $0x168] sm:$0xff]  ;;  %v1868_v22 = vpack.c.bf16 %v1260_v15, %v1259_v14 }
  0x5e   :  { %1891 = vmatprep.subr.bf16.mxu1 %v1890_v59  ;;  %v1309_v23 = vld [vmem:[#allocation7 + $0x1f0] sm:$0xff]  ;;  %v1310_v24 = vld [vmem:[#allocation7 + $0x1f8] sm:$0xff]  ;;  %v1870_v25 = vpack.c.bf16 %v1278_v18, %v1277_v17  ;;  %v1900_v29 = vpack.c.bf16 %v1292_v21, %v1291_v20  ;;  %v2324_v37 = vld [vmem:[#allocation2 + $0x8] sm:$0xff] }
  0x5f   :  { %1861 = vmatpush3.bf16.msra.mxu0 %v1860_v62  ;;  %v1261_v26 = vld [vmem:[#allocation7 + $0x70] sm:$0xff]  ;;  %v1262_v27 = vld [vmem:[#allocation7 + $0x78] sm:$0xff]  ;;  %v1902_v30 = vpack.c.bf16 %v1310_v24, %v1309_v23  ;;  %3707 = vst [vmem:[#allocation17_spill] sm:$0xff] %v2324_v37  ;;  %v2328_v39 = vld [vmem:[#allocation2 + $0x28] sm:$0xff] }
  0x60   :  { %1863 = vmatprep.subr.bf16.mxu0 %v1862_v1  ;;  %v1293_v31 = vld [vmem:[#allocation7 + $0x170] sm:$0xff]  ;;  %v1294_v32 = vld [vmem:[#allocation7 + $0x178] sm:$0xff]  ;;  %v1872_v33 = vpack.c.bf16 %v1262_v27, %v1261_v26  ;;  %3709 = vst [vmem:[#allocation19_spill] sm:$0xff] %v2328_v39  ;;  %v2334_v43 = vld [vmem:[#allocation2 + $0x48] sm:$0xff] }
  0x61   :  { %1893 = vmatpush3.bf16.msra.mxu1 %v1892_v4  ;;  %v1904_v35 = vpack.c.bf16 %v1294_v32, %v1293_v31  ;;  %v2322_v36 = vld [vmem:[%s3589_s3] sm:$0x3f]  ;;  %3711 = vst [vmem:[#allocation21_spill] sm:$0xff] %v2334_v43  ;;  %v2338_v45 = vld [vmem:[#allocation2 + $0x68] sm:$0xff] }
  0x62   :  { %1895 = vmatprep.subr.bf16.mxu1 %v1894_v7  ;;  %3706 = vst [vmem:[#allocation16_spill] sm:$0xff] %v2322_v36  ;;  %v2326_v38 = vld [vmem:[#allocation2 + $0x18] sm:$0xff]  ;;  %3713 = vst [vmem:[#allocation23_spill] sm:$0xff] %v2338_v45  ;;  %v2342_v47 = vld [vmem:[#allocation2 + $0x88] sm:$0xff]  ;;  %v2376_v63 = vrot.slane %v2322_v36, %v3597_v40  ;;  %v2381_v0 = vrot.slane %v2322_v36, %v3596_v41 }
  0x63   :  { %1865 = vmatpush3.bf16.msra.mxu0 %v1864_v10  ;;  %3708 = vst [vmem:[#allocation18_spill] sm:$0xff] %v2326_v38  ;;  %v2332_v42 = vld [vmem:[#allocation2 + $0x38] sm:$0xff]  ;;  %3715 = vst [vmem:[#allocation25_spill] sm:$0xff] %v2342_v47  ;;  %v2346_v49 = vld [vmem:[#allocation2 + $0xa8] sm:$0xff] }
  0x64   :  { %1867 = vmatprep.subr.bf16.mxu0 %v1866_v13  ;;  %3710 = vst [vmem:[#allocation20_spill] sm:$0xff] %v2332_v42  ;;  %v2336_v44 = vld [vmem:[#allocation2 + $0x58] sm:$0xff]  ;;  %3717 = vst [vmem:[#allocation27_spill] sm:$0xff] %v2346_v49  ;;  %v2350_v51 = vld [vmem:[#allocation2 + $0xc8] sm:$0xff] }
  0x65   :  { %1897 = vmatpush3.bf16.msra.mxu1 %v1896_v16  ;;  %3712 = vst [vmem:[#allocation22_spill] sm:$0xff] %v2336_v44  ;;  %v2340_v46 = vld [vmem:[#allocation2 + $0x78] sm:$0xff]  ;;  %3719 = vst [vmem:[#allocation29_spill] sm:$0xff] %v2350_v51  ;;  %v2354_v53 = vld [vmem:[#allocation2 + $0xe8] sm:$0xff] }
  0x66   :  { %1899 = vmatprep.subr.bf16.mxu1 %v1898_v19  ;;  %3714 = vst [vmem:[#allocation24_spill] sm:$0xff] %v2340_v46  ;;  %v2344_v48 = vld [vmem:[#allocation2 + $0x98] sm:$0xff]  ;;  %3721 = vst [vmem:[#allocation31_spill] sm:$0xff] %v2354_v53  ;;  %v2359_v56 = vld [vmem:[#allocation2 + $0x108] sm:$0xff] }
  0x67   :  { %1869 = vmatpush3.bf16.msra.mxu0 %v1868_v22  ;;  %3716 = vst [vmem:[#allocation26_spill] sm:$0xff] %v2344_v48  ;;  %v2348_v50 = vld [vmem:[#allocation2 + $0xb8] sm:$0xff]  ;;  %3723 = vst [vmem:[#allocation33_spill] sm:$0xff] %v2359_v56  ;;  %v2363_v58 = vld [vmem:[#allocation2 + $0x128] sm:$0xff] }
  0x68   :  { %1871 = vmatprep.subr.bf16.mxu0 %v1870_v25  ;;  %3718 = vst [vmem:[#allocation28_spill] sm:$0xff] %v2348_v50  ;;  %v2352_v52 = vld [vmem:[#allocation2 + $0xd8] sm:$0xff]  ;;  %3725 = vst [vmem:[#allocation35_spill] sm:$0xff] %v2363_v58  ;;  %v2367_v60 = vld [vmem:[#allocation5 + $0x8] sm:$0xff] }
  0x69   :  { %1901 = vmatpush3.bf16.msra.mxu1 %v1900_v29  ;;  %3720 = vst [vmem:[#allocation30_spill] sm:$0xff] %v2352_v52  ;;  %v2356_v54 = vld [vmem:[#allocation2 + $0xf8] sm:$0xff]  ;;  %v2371_v62 = vld [vmem:[#allocation5 + $0x28] sm:$0xff]  ;;  %3727 = vst [vmem:[#allocation37_spill] sm:$0xff] %v2376_v63  ;;  %v2400_v9 = vmul.f32 %v2367_v60, %v2324_v37  ;;  %v2412_v12 = vmul.f32 %v2367_v60, %v2338_v45 }
  0x6a   :  { %1903 = vmatprep.subr.bf16.mxu1 %v1902_v30  ;;  %3722 = vst [vmem:[#allocation32_spill] sm:$0xff] %v2356_v54  ;;  %v2361_v57 = vld [vmem:[#allocation2 + $0x118] sm:$0xff]  ;;  %3728 = vst [vmem:[#allocation38_spill] sm:$0xff] %v2381_v0  ;;  %v2384_v2 = vld [vmem:[#allocation2 + $0x148] sm:$0xff]  ;;  %v2408_v11 = vmul.f32 %v2371_v62, %v2328_v39  ;;  %v2444_v23 = vmul.f32 %v2371_v62, %v2342_v47  ;;  %v221_v30 = vmul.f32 %v2367_v60, %v2350_v51 }
  0x6b   :  { %1873 = vmatpush3.bf16.msra.mxu0 %v1872_v33  ;;  %3724 = vst [vmem:[#allocation34_spill] sm:$0xff] %v2361_v57  ;;  %v2365_v59 = vld [vmem:[#allocation2 + $0x138] sm:$0xff]  ;;  %3729 = vst [vmem:[#allocation39_spill] sm:$0xff] %v2384_v2  ;;  %v2388_v4 = vld [vmem:[#allocation2 + $0x168] sm:$0xff]  ;;  %v225_v32 = vmul.f32 %v2371_v62, %v2354_v53  ;;  %v233_v0 = vmul.f32 %v2367_v60, %v2363_v58 }
  0x6c   :  { %3726 = vst [vmem:[#allocation36_spill] sm:$0xff] %v2365_v59  ;;  %v2369_v61 = vld [vmem:[#allocation5 + $0x18] sm:$0xff]  ;;  %3731 = vst [vmem:[#allocation41_spill] sm:$0xff] %v2388_v4  ;;  %v2394_v7 = vld [vmem:[#allocation5 + $0x48] sm:$0xff] }
  0x6d   :  { %1905 = vmatpush3.bf16.msra.mxu1 %v1904_v35  ;;  %v2386_v3 = vld [vmem:[#allocation2 + $0x158] sm:$0xff]  ;;  %v2404_v10 = vmul.f32 %v2369_v61, %v2326_v38  ;;  %v2414_v13 = vld [vmem:[#allocation2 + $0x188] sm:$0xff]  ;;  %v2426_v17 = vmul.f32 %v2394_v7, %v2334_v43  ;;  %v2434_v19 = vmul.f32 %v2369_v61, %v2340_v46  ;;  %v2452_v25 = vmul.f32 %v2394_v7, %v2346_v49 }
  0x6e   :  { %3730 = vst [vmem:[#allocation40_spill] sm:$0xff] %v2386_v3  ;;  %v2390_v5 = vld [vmem:[#allocation2 + $0x178] sm:$0xff]  ;;  %3733 = vst [vmem:[#allocation43_spill] sm:$0xff] %v2414_v13  ;;  %v2418_v15 = vld [vmem:[#allocation2 + $0x1a8] sm:$0xff]  ;;  %v223_v31 = vmul.f32 %v2369_v61, %v2352_v52  ;;  %v2482_v40 = vmul.f32 %v2394_v7, %v2359_v56  ;;  %v235_v63 = vmul.f32 %v2369_v61, %v2365_v59 }
  0x6f   :  { %3732 = vst [vmem:[#allocation42_spill] sm:$0xff] %v2390_v5  ;;  %v2392_v6 = vld [vmem:[#allocation5 + $0x38] sm:$0xff]  ;;  %3735 = vst [vmem:[#allocation45_spill] sm:$0xff] %v2418_v15  ;;  %v2438_v21 = vld [vmem:[#allocation2 + $0x1c8] sm:$0xff]  ;;  %v237_v56 = vmul.f32 %v2371_v62, %v2384_v2 }
  0x70   :  { %v2396_v8 = vld [vmem:[#allocation5 + $0x58] sm:$0xff]  ;;  %v2422_v16 = vmul.f32 %v2392_v6, %v2332_v42  ;;  %3737 = vst [vmem:[#allocation47_spill] sm:$0xff] %v2438_v21  ;;  %v2448_v24 = vmul.f32 %v2392_v6, %v2344_v48  ;;  %v2458_v27 = vld [vmem:[#allocation2 + $0x1e8] sm:$0xff]  ;;  %v2472_v33 = vmul.f32 %v2392_v6, %v2356_v54  ;;  %v239_v51 = vmul.f32 %v2392_v6, %v2386_v3 }
  0x71   :  { %v2416_v14 = vld [vmem:[#allocation2 + $0x198] sm:$0xff]  ;;  %v2430_v18 = vmul.f32 %v2396_v8, %v2336_v44  ;;  %v2456_v26 = vmul.f32 %v2396_v8, %v2348_v50  ;;  %3739 = vst [vmem:[#allocation49_spill] sm:$0xff] %v2458_v27  ;;  %v2462_v29 = vld [vmem:[#allocation2 + $0x208] sm:$0xff]  ;;  %v2486_v1 = vmul.f32 %v2396_v8, %v2361_v57  ;;  %v241_v57 = vmul.f32 %v2394_v7, %v2388_v4 }
  0x72   :  { %3734 = vst [vmem:[#allocation44_spill] sm:$0xff] %v2416_v14  ;;  %v2436_v20 = vld [vmem:[#allocation2 + $0x1b8] sm:$0xff]  ;;  %3741 = vst [vmem:[#allocation51_spill] sm:$0xff] %v2462_v29  ;;  %v2476_v55 = vld [vmem:[#allocation2 + $0x228] sm:$0xff]  ;;  %v2506_v58 = vmul.f32 %v2396_v8, %v2390_v5  ;;  %v245_v48 = vmul.f32 %v2367_v60, %v2414_v13  ;;  %v247_v2 = vmul.f32 %v2369_v61, %v2416_v14 }
  0x73   :  { %3736 = vst [vmem:[#allocation46_spill] sm:$0xff] %v2436_v20  ;;  %v2440_v22 = vld [vmem:[#allocation2 + $0x1d8] sm:$0xff]  ;;  %3743 = vst [vmem:[#allocation53_spill] sm:$0xff] %v2476_v55  ;;  %v2492_v54 = vld [vmem:[#allocation2 + $0x248] sm:$0xff]  ;;  %v249_v3 = vmul.f32 %v2371_v62, %v2418_v15  ;;  %v251_v4 = vmul.f32 %v2392_v6, %v2436_v20  ;;  %v253_v45 = vmul.f32 %v2394_v7, %v2438_v21 }
  0x74   :  { %3738 = vst [vmem:[#allocation48_spill] sm:$0xff] %v2440_v22  ;;  %v2460_v28 = vld [vmem:[#allocation2 + $0x1f8] sm:$0xff]  ;;  %3745 = vst [vmem:[#allocation55_spill] sm:$0xff] %v2492_v54  ;;  %v2496_v52 = vld [vmem:[#allocation2 + $0x268] sm:$0xff]  ;;  %v255_v13 = vmul.f32 %v2396_v8, %v2440_v22  ;;  %v257_v14 = vmul.f32 %v2367_v60, %v2458_v27  ;;  %v261_v42 = vmul.f32 %v2371_v62, %v2462_v29 }
  0x75   :  { %3740 = vst [vmem:[#allocation50_spill] sm:$0xff] %v2460_v28  ;;  %v2474_v35 = vld [vmem:[#allocation2 + $0x218] sm:$0xff]  ;;  %3747 = vst [vmem:[#allocation57_spill] sm:$0xff] %v2496_v52  ;;  %v2510_v50 = vld [vmem:[#allocation2 + $0x288] sm:$0xff]  ;;  %v259_v15 = vmul.f32 %v2369_v61, %v2460_v28  ;;  %v265_v22 = vmul.f32 %v2394_v7, %v2476_v55  ;;  %v269_v28 = vmul.f32 %v2367_v60, %v2492_v54 }
  0x76   :  { %3742 = vst [vmem:[#allocation52_spill] sm:$0xff] %v2474_v35  ;;  %v2478_v41 = vld [vmem:[#allocation2 + $0x238] sm:$0xff]  ;;  %3749 = vst [vmem:[#allocation59_spill] sm:$0xff] %v2510_v50  ;;  %v2522_v5 = vld [vmem:[#allocation2 + $0x2a8] sm:$0xff]  ;;  %v263_v21 = vmul.f32 %v2392_v6, %v2474_v35  ;;  %v273_v38 = vmul.f32 %v2371_v62, %v2496_v52  ;;  %v277_v35 = vmul.f32 %v2394_v7, %v2510_v50 }
  0x77   :  { %3744 = vst [vmem:[#allocation54_spill] sm:$0xff] %v2478_v41  ;;  %v2494_v53 = vld [vmem:[#allocation2 + $0x258] sm:$0xff]  ;;  %3751 = vst [vmem:[#allocation61_spill] sm:$0xff] %v2522_v5  ;;  %v2526_v46 = vld [vmem:[#allocation2 + $0x2c8] sm:$0xff]  ;;  %v267_v27 = vmul.f32 %v2396_v8, %v2478_v41  ;;  %v281_v41 = vmul.f32 %v2367_v60, %v2522_v5  ;;  %v325_v60 = vadd.f32 %v2434_v19, %v2412_v12 }
  0x78   :  { %3746 = vst [vmem:[#allocation56_spill] sm:$0xff] %v2494_v53  ;;  %v2508_v59 = vld [vmem:[#allocation2 + $0x278] sm:$0xff]  ;;  %3753 = vst [vmem:[#allocation63_spill] sm:$0xff] %v2526_v46  ;;  %v2538_v20 = vld [vmem:[#allocation2 + $0x2e8] sm:$0xff]  ;;  %v271_v39 = vmul.f32 %v2369_v61, %v2494_v53  ;;  %v285_v53 = vmul.f32 %v2371_v62, %v2526_v46  ;;  %v347_v5 = vadd.f32 %v223_v31, %v221_v30 }
  0x79   :  { %3748 = vst [vmem:[#allocation58_spill] sm:$0xff] %v2508_v59  ;;  %v2512_v49 = vld [vmem:[#allocation2 + $0x298] sm:$0xff]  ;;  %3755 = vst [vmem:[#allocation65_spill] sm:$0xff] %v2538_v20  ;;  %v275_v29 = vmul.f32 %v2392_v6, %v2508_v59  ;;  %v289_v59 = vmul.f32 %v2394_v7, %v2538_v20  ;;  %v413_v37 = vadd.f32 %v259_v15, %v257_v14 }
  0x7a   :  { %3750 = vst [vmem:[#allocation60_spill] sm:$0xff] %v2512_v49  ;;  %v2524_v47 = vld [vmem:[#allocation2 + $0x2b8] sm:$0xff]  ;;  %v279_v55 = vmul.f32 %v2396_v8, %v2512_v49  ;;  %v303_v49 = vadd.f32 %v2404_v10, %v2400_v9  ;;  %v435_v62 = vadd.f32 %v271_v39, %v269_v28  ;;  %v348_v7 = vadd.f32 %v347_v5, %v225_v32 }
  0x7b   :  { %3752 = vst [vmem:[#allocation62_spill] sm:$0xff] %v2524_v47  ;;  %v2536_v44 = vld [vmem:[#allocation2 + $0x2d8] sm:$0xff]  ;;  %v283_v54 = vmul.f32 %v2369_v61, %v2524_v47  ;;  %v369_v61 = vadd.f32 %v235_v63, %v233_v0  ;;  %v391_v47 = vadd.f32 %v247_v2, %v245_v48 }
  0x7c   :  { %3754 = vst [vmem:[#allocation64_spill] sm:$0xff] %v2536_v44  ;;  %v2540_v43 = vld [vmem:[#allocation2 + $0x2f8] sm:$0xff]  ;;  %v287_v52 = vmul.f32 %v2392_v6, %v2536_v44  ;;  %v304_v6 = vadd.f32 %v303_v49, %v2408_v11  ;;  %v326_v44 = vadd.f32 %v325_v60, %v2444_v23  ;;  %v349_v63 = vadd.f32 %v348_v7, %v2472_v33 }
  0x7d   :  { %3756 = vst [vmem:[#allocation66_spill] sm:$0xff] %v2540_v43  ;;  %v291_v50 = vmul.f32 %v2396_v8, %v2540_v43  ;;  %v457_v46 = vadd.f32 %v283_v54, %v281_v41  ;;  %v370_v20 = vadd.f32 %v369_v61, %v237_v56  ;;  %v392_v36 = vadd.f32 %v391_v47, %v249_v3 }
  0x7e   :  { %v414_v8 = vadd.f32 %v413_v37, %v261_v42  ;;  %v436_v43 = vadd.f32 %v435_v62, %v273_v38  ;;  %v305_v9 = vadd.f32 %v304_v6, %v2422_v16  ;;  %v327_v10 = vadd.f32 %v326_v44, %v2448_v24  ;;  %v2593_v62 = vld [vmem:[%s3590_s4] sm:$0x3f] }
  0x7f   :  { %v458_v34 = vadd.f32 %v457_v46, %v285_v53  ;;  %v371_v48 = vadd.f32 %v370_v20, %v239_v51  ;;  %v393_v0 = vadd.f32 %v392_v36, %v251_v4  ;;  %v350_v47 = vadd.f32 %v349_v63, %v2482_v40  ;;  %3757 = vst [vmem:[#allocation67_spill] sm:$0xff] %v2593_v62 }
  0x80   :  { %v415_v39 = vadd.f32 %v414_v8, %v263_v21  ;;  %v437_v41 = vadd.f32 %v436_v43, %v275_v29  ;;  %v306_v49 = vadd.f32 %v305_v9, %v2426_v17  ;;  %v328_v2 = vadd.f32 %v327_v10, %v2452_v25  ;;  %v2595_v10 = vld [vmem:[#allocation5 + $0x68] sm:$0xff] }
  0x81   :  { %v459_v54 = vadd.f32 %v458_v34, %v287_v52  ;;  %v372_v37 = vadd.f32 %v371_v48, %v241_v57  ;;  %v394_v38 = vadd.f32 %v393_v0, %v253_v45  ;;  %v351_v36 = vadd.f32 %v350_v47, %v2486_v1 }
  0x82   :  { %v416_v42 = vadd.f32 %v415_v39, %v265_v22  ;;  %v438_v46 = vadd.f32 %v437_v41, %v277_v35  ;;  %v307_v44 = vadd.f32 %v306_v49, %v2430_v18  ;;  %v329_v56 = vadd.f32 %v328_v2, %v2456_v26  ;;  %v472_v41 = vld [vmem:[#allocation5 + $0x78] sm:$0xff] }
  0x83   :  { %v460_v53 = vadd.f32 %v459_v54, %v289_v59  ;;  %v373_v43 = vadd.f32 %v372_v37, %v2506_v58  ;;  %v395_v34 = vadd.f32 %v394_v38, %v255_v13  ;;  %v352_v40 = vrot.slane %v351_v36, 4  ;;  %v474_v54 = vld [vmem:[#allocation5 + $0x88] sm:$0xff]  ;;  %v476_v49 = vld [vmem:[#allocation5 + $0x98] sm:$0xff] }
  0x84   :  { %v417_v51 = vadd.f32 %v416_v42, %v267_v27  ;;  %v439_v52 = vadd.f32 %v438_v46, %v279_v55  ;;  %v308_v4 = vrot.slane %v307_v44, 4  ;;  %v330_v5 = vrot.slane %v329_v56, 4  ;;  %v478_v38 = vld [vmem:[#allocation5 + $0xa8] sm:$0xff]  ;;  %v480_v42 = vld [vmem:[#allocation5 + $0xb8] sm:$0xff] }
  0x85   :  { %v461_v3 = vadd.f32 %v460_v53, %v291_v50  ;;  %v374_v57 = vrot.slane %v373_v43, 4  ;;  %v396_v45 = vrot.slane %v395_v34, 4  ;;  %v353_v16 = vadd.f32 %v352_v40, %v351_v36  ;;  %v3758_v46 = vld [vmem:[#allocation15_spill] sm:$0xff] }
  0x86   :  { %v418_v11 = vrot.slane %v417_v51, 4  ;;  %v440_v12 = vrot.slane %v439_v52, 4  ;;  %v309_v14 = vadd.f32 %v308_v4, %v307_v44  ;;  %v331_v15 = vadd.f32 %v330_v5, %v329_v56  ;;  %v3760_v44 = vld [vmem:[#allocation16_spill] sm:$0xff]  ;;  %v3766_v5 = vld [vmem:[#allocation18_spill] sm:$0xff] }
  0x87   :  { %v462_v59 = vrot.slane %v461_v3, 4  ;;  %v375_v17 = vadd.f32 %v374_v57, %v373_v43  ;;  %v397_v1 = vadd.f32 %v396_v45, %v395_v34  ;;  %v354_v19 = vrot.slane %v353_v16, 2  ;;  %v3767_v57 = vld [vmem:[#allocation19_spill] sm:$0xff] }
  0x88   :  { %v419_v58 = vadd.f32 %v418_v11, %v417_v51  ;;  %v441_v13 = vadd.f32 %v440_v12, %v439_v52  ;;  %v310_v50 = vrot.slane %v309_v14, 2  ;;  %v332_v55 = vrot.slane %v331_v15, 2  ;;  %v3765_v52 = vld [vmem:[#allocation17_spill] sm:$0xff]  ;;  %v3768_v11 = vld [vmem:[#allocation20_spill] sm:$0xff] }
  0x89   :  { %v463_v18 = vadd.f32 %v462_v59, %v461_v3  ;;  %v376_v20 = vrot.slane %v375_v17, 2  ;;  %v398_v21 = vrot.slane %v397_v1, 2  ;;  %v355_v27 = vadd.f32 %v354_v19, %v353_v16  ;;  %v3771_v16 = vld [vmem:[#allocation22_spill] sm:$0xff] }
  0x8a   :  { %v420_v22 = vrot.slane %v419_v58, 2  ;;  %v442_v23 = vrot.slane %v441_v13, 2  ;;  %v311_v25 = vadd.f32 %v310_v50, %v309_v14  ;;  %v333_v26 = vadd.f32 %v332_v55, %v331_v15  ;;  %v3769_v14 = vld [vmem:[#allocation21_spill] sm:$0xff] }
  0x8b   :  { %v464_v24 = vrot.slane %v463_v18, 2  ;;  %v377_v28 = vadd.f32 %v376_v20, %v375_v17  ;;  %v399_v29 = vadd.f32 %v398_v21, %v397_v1  ;;  %v356_v60 = vrot.slane %v355_v27, 1  ;;  %v3773_v1 = vld [vmem:[#allocation23_spill] sm:$0xff]  ;;  %v3775_v55 = vld [vmem:[#allocation25_spill] sm:$0xff]  ;;  %v3776_v20 = vld [vmem:[#allocation26_spill] sm:$0xff] }
  0x8c   :  { %v421_v30 = vadd.f32 %v420_v22, %v419_v58  ;;  %v443_v31 = vadd.f32 %v442_v23, %v441_v13  ;;  %v312_v33 = vrot.slane %v311_v25, 1  ;;  %v334_v35 = vrot.slane %v333_v26, 1  ;;  %v3777_v23 = vld [vmem:[#allocation27_spill] sm:$0xff] }
  0x8d   :  { %v465_v32 = vadd.f32 %v464_v24, %v463_v18  ;;  %v378_v61 = vrot.slane %v377_v28, 1  ;;  %v400_v6 = vrot.slane %v399_v29, 1  ;;  %v357_v0 = vadd.f32 %v356_v60, %v355_v27  ;;  %v3774_v18 = vld [vmem:[#allocation24_spill] sm:$0xff]  ;;  %v3781_v27 = vld [vmem:[#allocation29_spill] sm:$0xff] }
  0x8e   :  { %v422_v7 = vrot.slane %v421_v30, 1  ;;  %v444_v8 = vrot.slane %v443_v31, 1  ;;  %v313_v63 = vadd.f32 %v312_v33, %v311_v25  ;;  %v335_v48 = vadd.f32 %v334_v35, %v333_v26  ;;  %v3779_v25 = vld [vmem:[#allocation28_spill] sm:$0xff] }
  0x8f   :  { %v466_v9 = vrot.slane %v465_v32, 1  ;;  %v379_v39 = vadd.f32 %v378_v61, %v377_v28  ;;  %v401_v2 = vadd.f32 %v400_v6, %v399_v29  ;;  %v3759_v53 = vsub.s32 0, %v3758_v46  ;;  %v3785_v35 = vld [vmem:[#allocation32_spill] sm:$0xff]  ;;  %v3786_v61 = vld [vmem:[#allocation33_spill] sm:$0xff] }
  0x90   :  { %v423_v47 = vadd.f32 %v422_v7, %v421_v30  ;;  %v445_v37 = vadd.f32 %v444_v8, %v443_v31  ;;  %v1068_v43 = vsel %vm1054_vm0, %v335_v48, %v313_v63  ;;  %v3763_v34 = vsub.s32 1, %v3758_v46  ;;  %v3783_v30 = vld [vmem:[#allocation30_spill] sm:$0xff]  ;;  %v3790_v48 = vld [vmem:[#allocation36_spill] sm:$0xff] }
  0x91   :  { %v2600_v56 = vrot.slane %v3760_v44, %v3759_v53  ;;  %v2602_v36 = vadd.f32 %v466_v9, %v465_v32  ;;  %v482_v3 = vmul.f32 %v2595_v10, %v3765_v52  ;;  %v1069_v4 = vsel %vm1056_vm1, %v357_v0, %v1068_v43  ;;  %v3784_v32 = vld [vmem:[#allocation31_spill] sm:$0xff]  ;;  %v3787_v7 = vld [vmem:[#allocation34_spill] sm:$0xff]  ;;  %v3793_v53 = vld [vmem:[#allocation41_spill] sm:$0xff] }
  0x92   :  { %v2608_v51 = vrot.slane %v2593_v62, %v3763_v34  ;;  %v484_v40 = vmul.f32 %v472_v41, %v3766_v5  ;;  %v486_v45 = vmul.f32 %v474_v54, %v3767_v57  ;;  %v2616_v12 = vmul.f32 %v476_v49, %v3768_v11  ;;  %v3789_v9 = vld [vmem:[#allocation35_spill] sm:$0xff]  ;;  %v3794_v43 = vld [vmem:[#allocation42_spill] sm:$0xff]  ;;  %v3796_v5 = vld [vmem:[#allocation44_spill] sm:$0xff] }
  0x93   :  { %3761 = vst [vmem:[#allocation16_spill] sm:$0xff] %v2600_v56  ;;  %3762 = vst [vmem:[#allocation68_spill] sm:$0xff] %v2602_v36  ;;  %v1070_v59 = vsel %vm1058_vm2, %v379_v39, %v1069_v4  ;;  %v2620_v15 = vmul.f32 %v478_v38, %v3769_v14  ;;  %v2623_v17 = vmul.f32 %v480_v42, %v3771_v16  ;;  %v3791_v39 = vld [vmem:[#allocation39_spill] sm:$0xff]  ;;  %v3797_v11 = vld [vmem:[#allocation45_spill] sm:$0xff] }
  0x94   :  { %3764 = vst [vmem:[#allocation69_spill] sm:$0xff] %v2608_v51  ;;  %v494_v58 = vmul.f32 %v2595_v10, %v3773_v1  ;;  %v1071_v13 = vsel %vm1060_vm3, %v401_v2, %v1070_v59  ;;  %v496_v50 = vmul.f32 %v472_v41, %v3774_v18  ;;  %v498_v19 = vmul.f32 %v474_v54, %v3775_v55  ;;  %v3795_v52 = vld [vmem:[#allocation43_spill] sm:$0xff]  ;;  %v3798_v14 = vld [vmem:[#allocation46_spill] sm:$0xff]  ;;  %v3800_v18 = vld [vmem:[#allocation48_spill] sm:$0xff] }
  0x95   :  { %3770 = vst [vmem:[#allocation17_spill] sm:$0xff] %v2620_v15  ;;  %3772 = vst [vmem:[#allocation18_spill] sm:$0xff] %v2623_v17  ;;  %v500_v21 = vmul.f32 %v476_v49, %v3776_v20  ;;  %v1072_v22 = vsel %vm1062_vm4, %v423_v47, %v1071_v13  ;;  %v2633_v24 = vmul.f32 %v478_v38, %v3777_v23  ;;  %v3792_v47 = vld [vmem:[#allocation40_spill] sm:$0xff]  ;;  %v3799_v1 = vld [vmem:[#allocation47_spill] sm:$0xff] }
  0x96   :  { %v2636_v26 = vmul.f32 %v480_v42, %v3779_v25  ;;  %v506_v28 = vmul.f32 %v2595_v10, %v3781_v27  ;;  %v2641_v29 = vsel %vm1064_vm5, %v445_v37, %v1072_v22  ;;  %v508_v31 = vmul.f32 %v472_v41, %v3783_v30  ;;  %v3801_v20 = vld [vmem:[#allocation49_spill] sm:$0xff]  ;;  %v3802_v23 = vld [vmem:[#allocation50_spill] sm:$0xff]  ;;  %v3803_v27 = vld [vmem:[#allocation51_spill] sm:$0xff] }
  0x97   :  { %3778 = vst [vmem:[#allocation19_spill] sm:$0xff] %v2633_v24  ;;  %3782 = vst [vmem:[#allocation21_spill] sm:$0xff] %v2641_v29  ;;  %v510_v33 = vmul.f32 %v474_v54, %v3784_v32  ;;  %v512_v60 = vmul.f32 %v476_v49, %v3785_v35  ;;  %v514_v6 = vmul.f32 %v478_v38, %v3786_v61  ;;  %v3804_v32 = vld [vmem:[#allocation52_spill] sm:$0xff]  ;;  %v3805_v61 = vld [vmem:[#allocation53_spill] sm:$0xff] }
  0x98   :  { %3780 = vst [vmem:[#allocation20_spill] sm:$0xff] %v2636_v26  ;;  %v2648_v8 = vmul.f32 %v480_v42, %v3787_v7  ;;  %v518_v63 = vmul.f32 %v2595_v10, %v3789_v9  ;;  %v520_v0 = vmul.f32 %v472_v41, %v3790_v48  ;;  %v522_v2 = vmul.f32 %v474_v54, %v3791_v39  ;;  %v3806_v9 = vld [vmem:[#allocation54_spill] sm:$0xff]  ;;  %v3807_v39 = vld [vmem:[#allocation55_spill] sm:$0xff]  ;;  %v3816_v62 = vld [vmem:[#allocation64_spill] sm:$0xff] }
  0x99   :  { %v524_v37 = vmul.f32 %v476_v49, %v3792_v47  ;;  %v526_v44 = vmul.f32 %v478_v38, %v3793_v53  ;;  %v528_v34 = vmul.f32 %v480_v42, %v3794_v43  ;;  %v530_v4 = vmul.f32 %v2595_v10, %v3795_v52  ;;  %v3808_v53 = vld [vmem:[#allocation56_spill] sm:$0xff]  ;;  %v3809_v52 = vld [vmem:[#allocation57_spill] sm:$0xff]  ;;  %v3814_v56 = vld [vmem:[#allocation62_spill] sm:$0xff] }
  0x9a   :  { %3788 = vst [vmem:[#allocation22_spill] sm:$0xff] %v2648_v8  ;;  %v532_v57 = vmul.f32 %v472_v41, %v3796_v5  ;;  %v534_v59 = vmul.f32 %v474_v54, %v3797_v11  ;;  %v536_v16 = vmul.f32 %v476_v49, %v3798_v14  ;;  %v538_v13 = vmul.f32 %v478_v38, %v3799_v1  ;;  %v3810_v11 = vld [vmem:[#allocation58_spill] sm:$0xff]  ;;  %v3811_v1 = vld [vmem:[#allocation59_spill] sm:$0xff] }
  0x9b   :  { %v540_v55 = vmul.f32 %v480_v42, %v3800_v18  ;;  %v542_v22 = vmul.f32 %v2595_v10, %v3801_v20  ;;  %v544_v25 = vmul.f32 %v472_v41, %v3802_v23  ;;  %v546_v30 = vmul.f32 %v474_v54, %v3803_v27  ;;  %v3812_v20 = vld [vmem:[#allocation60_spill] sm:$0xff]  ;;  %v3813_v27 = vld [vmem:[#allocation61_spill] sm:$0xff]  ;;  %v3815_v51 = vld [vmem:[#allocation63_spill] sm:$0xff] }
  0x9c   :  { %v548_v35 = vmul.f32 %v476_v49, %v3804_v32  ;;  %v550_v7 = vmul.f32 %v478_v38, %v3805_v61  ;;  %v552_v48 = vmul.f32 %v480_v42, %v3806_v9  ;;  %v554_v47 = vmul.f32 %v2595_v10, %v3807_v39  ;;  %v3817_v39 = vld [vmem:[#allocation65_spill] sm:$0xff] }
  0x9d   :  { %v556_v43 = vmul.f32 %v472_v41, %v3808_v53  ;;  %v558_v5 = vmul.f32 %v474_v54, %v3809_v52  ;;  %v560_v14 = vmul.f32 %v476_v49, %v3810_v11  ;;  %v562_v18 = vmul.f32 %v478_v38, %v3811_v1  ;;  %v3818_v53 = vld [vmem:[#allocation66_spill] sm:$0xff] }
  0x9e   :  { %v564_v23 = vmul.f32 %v480_v42, %v3812_v20  ;;  %v566_v32 = vmul.f32 %v2595_v10, %v3813_v27  ;;  %v568_v61 = vmul.f32 %v472_v41, %v3814_v56  ;;  %v570_v9 = vmul.f32 %v474_v54, %v3815_v51 }
  0x9f   :  { %v572_v46 = vmul.f32 %v476_v49, %v3816_v62  ;;  %v574_v36 = vmul.f32 %v478_v38, %v3817_v39  ;;  %v576_v29 = vmul.f32 %v480_v42, %v3818_v53  ;;  %v588_v52 = vadd.f32 %v484_v40, %v482_v3 }
  0xa0   :  { %v610_v8 = vadd.f32 %v496_v50, %v494_v58  ;;  %v632_v11 = vadd.f32 %v508_v31, %v506_v28  ;;  %v654_v26 = vadd.f32 %v520_v0, %v518_v63  ;;  %v676_v1 = vadd.f32 %v532_v57, %v530_v4  ;;  %v3819_v31 = vld [vmem:[#allocation17_spill] sm:$0xff]  ;;  %v3820_v0 = vld [vmem:[#allocation19_spill] sm:$0xff] }
  0xa1   :  { %v698_v17 = vadd.f32 %v544_v25, %v542_v22  ;;  %v720_v20 = vadd.f32 %v556_v43, %v554_v47  ;;  %v742_v24 = vadd.f32 %v568_v61, %v566_v32  ;;  %v589_v15 = vadd.f32 %v588_v52, %v486_v45 }
  0xa2   :  { %v611_v10 = vadd.f32 %v610_v8, %v498_v19  ;;  %v633_v27 = vadd.f32 %v632_v11, %v510_v33  ;;  %v655_v41 = vadd.f32 %v654_v26, %v522_v2  ;;  %v677_v56 = vadd.f32 %v676_v1, %v534_v59 }
  0xa3   :  { %v699_v54 = vadd.f32 %v698_v17, %v546_v30  ;;  %v721_v51 = vadd.f32 %v720_v20, %v558_v5  ;;  %v743_v62 = vadd.f32 %v742_v24, %v570_v9  ;;  %v590_v49 = vadd.f32 %v589_v15, %v2616_v12  ;;  %v3821_v24 = vld [vmem:[#allocation18_spill] sm:$0xff]  ;;  %v3822_v12 = vld [vmem:[#allocation20_spill] sm:$0xff] }
  0xa4   :  { %v612_v38 = vadd.f32 %v611_v10, %v500_v21  ;;  %v634_v42 = vadd.f32 %v633_v27, %v512_v60  ;;  %v656_v3 = vadd.f32 %v655_v41, %v524_v37  ;;  %v678_v40 = vadd.f32 %v677_v56, %v536_v16  ;;  %v3823_v21 = vld [vmem:[#allocation22_spill] sm:$0xff] }
  0xa5   :  { %v700_v58 = vadd.f32 %v699_v54, %v548_v35  ;;  %v722_v50 = vadd.f32 %v721_v51, %v560_v14  ;;  %v744_v28 = vadd.f32 %v743_v62, %v572_v46  ;;  %v591_v63 = vadd.f32 %v590_v49, %v3819_v31  ;;  %v1327_v54 = vld [vmem:[#allocation7 + $0x280] sm:$0xff]  ;;  %v1328_v51 = vld [vmem:[#allocation7 + $0x288] sm:$0xff] }
  0xa6   :  { %v613_v45 = vadd.f32 %v612_v38, %v3820_v0  ;;  %v635_v19 = vadd.f32 %v634_v42, %v514_v6  ;;  %v657_v33 = vadd.f32 %v656_v3, %v526_v44  ;;  %v679_v26 = vadd.f32 %v678_v40, %v538_v13  ;;  %v2691_v3 = vld [vmem:[#allocation2] sm:$0xff]  ;;  %v2693_v40 = vld [vmem:[#allocation2 + $0x10] sm:$0xff] }
  0xa7   :  { %v701_v8 = vadd.f32 %v700_v58, %v550_v7  ;;  %v723_v17 = vadd.f32 %v722_v50, %v562_v18  ;;  %v745_v2 = vadd.f32 %v744_v28, %v574_v36  ;;  %v592_v4 = vadd.f32 %v591_v63, %v3821_v24  ;;  %3824 = vst [vmem:[#allocation23_spill] sm:$0xff] %v2691_v3  ;;  %v2695_v58 = vld [vmem:[#allocation2 + $0x20] sm:$0xff]  ;;  %v2697_v0 = vld [vmem:[#allocation2 + $0x30] sm:$0xff] }
  0xa8   :  { %v614_v15 = vadd.f32 %v613_v45, %v3822_v12  ;;  %v636_v60 = vadd.f32 %v635_v19, %v3823_v21  ;;  %v658_v37 = vadd.f32 %v657_v33, %v528_v34  ;;  %v680_v57 = vadd.f32 %v679_v26, %v540_v55  ;;  %3825 = vst [vmem:[#allocation24_spill] sm:$0xff] %v2693_v40  ;;  %v2699_v45 = vld [vmem:[#allocation2 + $0x40] sm:$0xff]  ;;  %v2701_v19 = vld [vmem:[#allocation2 + $0x50] sm:$0xff] }
  0xa9   :  { %v702_v59 = vadd.f32 %v701_v8, %v552_v48  ;;  %v724_v46 = vadd.f32 %v723_v17, %v564_v23  ;;  %v746_v16 = vadd.f32 %v745_v2, %v576_v29  ;;  %v593_v22 = vrot.slane %v592_v4, 4  ;;  %3826 = vst [vmem:[#allocation25_spill] sm:$0xff] %v2695_v58  ;;  %3827 = vst [vmem:[#allocation26_spill] sm:$0xff] %v2697_v0  ;;  %v2703_v2 = vld [vmem:[#allocation2 + $0x60] sm:$0xff]  ;;  %v2705_v24 = vld [vmem:[#allocation2 + $0x70] sm:$0xff] }
  0xaa   :  { %v615_v25 = vrot.slane %v614_v15, 4  ;;  %v637_v6 = vrot.slane %v636_v60, 4  ;;  %v659_v44 = vrot.slane %v658_v37, 4  ;;  %v681_v13 = vrot.slane %v680_v57, 4  ;;  %3828 = vst [vmem:[#allocation27_spill] sm:$0xff] %v2699_v45  ;;  %3829 = vst [vmem:[#allocation28_spill] sm:$0xff] %v2701_v19 }
  0xab   :  { %v703_v30 = vrot.slane %v702_v59, 4  ;;  %v725_v35 = vrot.slane %v724_v46, 4  ;;  %v747_v36 = vrot.slane %v746_v16, 4  ;;  %v594_v7 = vadd.f32 %v593_v22, %v592_v4  ;;  %3830 = vst [vmem:[#allocation29_spill] sm:$0xff] %v2703_v2  ;;  %3831 = vst [vmem:[#allocation30_spill] sm:$0xff] %v2705_v24  ;;  %v2707_v4 = vld [vmem:[#allocation2 + $0x80] sm:$0xff] }
  0xac   :  { %v616_v47 = vadd.f32 %v615_v25, %v614_v15  ;;  %v638_v43 = vadd.f32 %v637_v6, %v636_v60  ;;  %v660_v5 = vadd.f32 %v659_v44, %v658_v37  ;;  %v682_v14 = vadd.f32 %v681_v13, %v680_v57  ;;  %3832 = vst [vmem:[#allocation31_spill] sm:$0xff] %v2707_v4  ;;  %v2709_v12 = vld [vmem:[#allocation5] sm:$0xff]  ;;  %v2711_v15 = vld [vmem:[#allocation5 + $0x10] sm:$0xff]  ;;  %v3833_v60 = vld [vmem:[#allocation21_spill] sm:$0xff] }
  0xad   :  { %v704_v18 = vadd.f32 %v703_v30, %v702_v59  ;;  %v726_v34 = vadd.f32 %v725_v35, %v724_v46  ;;  %v748_v55 = vadd.f32 %v747_v36, %v746_v16  ;;  %v595_v48 = vrot.slane %v594_v7, 2  ;;  %v2713_v21 = vld [vmem:[#allocation5 + $0x20] sm:$0xff]  ;;  %v3834_v37 = vld [vmem:[#allocation68_spill] sm:$0xff] }
  0xae   :  { %v617_v23 = vrot.slane %v616_v47, 2  ;;  %v639_v29 = vrot.slane %v638_v43, 2  ;;  %v661_v32 = vrot.slane %v660_v5, 2  ;;  %v683_v61 = vrot.slane %v682_v14, 2  ;;  %v2720_v22 = vld [vmem:[#allocation2 + $0x90] sm:$0xff]  ;;  %v2722_v25 = vld [vmem:[#allocation2 + $0xa0] sm:$0xff] }
  0xaf   :  { %v705_v9 = vrot.slane %v704_v18, 2  ;;  %v727_v39 = vrot.slane %v726_v34, 2  ;;  %v749_v53 = vrot.slane %v748_v55, 2  ;;  %v596_v52 = vadd.f32 %v595_v48, %v594_v7  ;;  %3835 = vst [vmem:[#allocation32_spill] sm:$0xff] %v2720_v22  ;;  %3836 = vst [vmem:[#allocation33_spill] sm:$0xff] %v2722_v25  ;;  %v2724_v6 = vld [vmem:[#allocation2 + $0xb0] sm:$0xff] }
  0xb0   :  { %v618_v11 = vadd.f32 %v617_v23, %v616_v47  ;;  %v640_v1 = vadd.f32 %v639_v29, %v638_v43  ;;  %v662_v20 = vadd.f32 %v661_v32, %v660_v5  ;;  %v684_v10 = vadd.f32 %v683_v61, %v682_v14  ;;  %3837 = vst [vmem:[#allocation34_spill] sm:$0xff] %v2724_v6  ;;  %v2726_v44 = vld [vmem:[#allocation5 + $0x30] sm:$0xff]  ;;  %v2728_v13 = vld [vmem:[#allocation5 + $0x40] sm:$0xff]  ;;  %v3838_v7 = vld [vmem:[#allocation15_spill] sm:$0xff] }
  0xb1   :  { %v706_v27 = vadd.f32 %v705_v9, %v704_v18  ;;  %v728_v41 = vadd.f32 %v727_v39, %v726_v34  ;;  %v750_v56 = vadd.f32 %v749_v53, %v748_v55  ;;  %v597_v62 = vrot.slane %v596_v52, 1  ;;  %v2730_v30 = vld [vmem:[#allocation5 + $0x50] sm:$0xff]  ;;  %v3840_v43 = vld [vmem:[#allocation67_spill] sm:$0xff]  ;;  %v2738_v18 = vld [vmem:[#allocation2 + $0xc0] sm:$0xff] }
  0xb2   :  { %v619_v49 = vrot.slane %v618_v11, 1  ;;  %v641_v38 = vrot.slane %v640_v1, 1  ;;  %v663_v42 = vrot.slane %v662_v20, 1  ;;  %v685_v50 = vrot.slane %v684_v10, 1  ;;  %3841 = vst [vmem:[#allocation35_spill] sm:$0xff] %v2738_v18  ;;  %v2740_v34 = vld [vmem:[#allocation2 + $0xd0] sm:$0xff] }
  0xb3   :  { %v707_v28 = vrot.slane %v706_v27, 1  ;;  %v729_v31 = vrot.slane %v728_v41, 1  ;;  %v751_v63 = vrot.slane %v750_v56, 1  ;;  %v598_v33 = vadd.f32 %v597_v62, %v596_v52  ;;  %3842 = vst [vmem:[#allocation36_spill] sm:$0xff] %v2740_v34  ;;  %v2742_v55 = vld [vmem:[#allocation2 + $0xe0] sm:$0xff]  ;;  %v2745_v23 = vld [vmem:[#allocation2 + $0xf0] sm:$0xff] }
  0xb4   :  { %v620_v26 = vadd.f32 %v619_v49, %v618_v11  ;;  %v642_v8 = vadd.f32 %v641_v38, %v640_v1  ;;  %v664_v17 = vadd.f32 %v663_v42, %v662_v20  ;;  %v2718_v57 = vsel %vm1066_vm6, %v3834_v37, %v3833_v60  ;;  %3843 = vst [vmem:[#allocation39_spill] sm:$0xff] %v2742_v55  ;;  %v2747_v29 = vld [vmem:[#allocation2 + $0x100] sm:$0xff]  ;;  %v2749_v32 = vld [vmem:[#allocation2 + $0x110] sm:$0xff] }
  0xb5   :  { %v686_v59 = vadd.f32 %v685_v50, %v684_v10  ;;  %v708_v46 = vadd.f32 %v707_v28, %v706_v27  ;;  %v730_v16 = vadd.f32 %v729_v31, %v728_v41  ;;  %v752_v35 = vadd.f32 %v751_v63, %v750_v56  ;;  %3844 = vst [vmem:[#allocation40_spill] sm:$0xff] %v2745_v23  ;;  %v2764_v52 = vld [vmem:[#allocation2 + $0x120] sm:$0xff]  ;;  %v2766_v11 = vld [vmem:[#allocation2 + $0x130] sm:$0xff] }
  0xb6   :  { %v1100_v36 = vsel %vm1054_vm0, %v620_v26, %v598_v33  ;;  %v3839_v47 = vsub.s32 3, %v3838_v7  ;;  %v1906_v14 = vpack.c.bf16 %v1328_v51, %v1327_v54  ;;  %3845 = vst [vmem:[#allocation41_spill] sm:$0xff] %v2747_v29  ;;  %3846 = vst [vmem:[#allocation42_spill] sm:$0xff] %v2749_v32  ;;  %v2753_v61 = vmul.f32 %v2709_v12, %v2691_v3  ;;  %v2768_v1 = vld [vmem:[#allocation2 + $0x140] sm:$0xff]  ;;  %v2770_v20 = vld [vmem:[#allocation2 + $0x150] sm:$0xff] }
  0xb7   :  { %v1101_v48 = vsel %vm1056_vm1, %v642_v8, %v1100_v36  ;;  %v2757_v9 = vmul.f32 %v2711_v15, %v2693_v40  ;;  %v2761_v39 = vmul.f32 %v2713_v21, %v2695_v58  ;;  %3847 = vst [vmem:[#allocation43_spill] sm:$0xff] %v2764_v52  ;;  %3848 = vst [vmem:[#allocation44_spill] sm:$0xff] %v2766_v11  ;;  %v2785_v54 = vld [vmem:[#allocation2 + $0x160] sm:$0xff]  ;;  %v2787_v51 = vld [vmem:[#allocation2 + $0x170] sm:$0xff] }
  0xb8   :  { %v2736_v5 = vrot.slane %v3840_v43, %v3839_v47  ;;  %v1102_v53 = vsel %vm1058_vm2, %v664_v17, %v1101_v48  ;;  %1907 = vmatprep.subr.bf16.mxu0 %v1906_v14  ;;  %3849 = vst [vmem:[#allocation45_spill] sm:$0xff] %v2768_v1  ;;  %3850 = vst [vmem:[#allocation46_spill] sm:$0xff] %v2770_v20  ;;  %v2774_v10 = vmul.f32 %v2726_v44, %v2697_v0  ;;  %v2789_v62 = vld [vmem:[#allocation2 + $0x180] sm:$0xff]  ;;  %v2804_v28 = vld [vmem:[#allocation2 + $0x190] sm:$0xff] }
  0xb9   :  { %v2778_v27 = vmul.f32 %v2728_v13, %v2699_v45  ;;  %v2782_v41 = vmul.f32 %v2730_v30, %v2701_v19  ;;  %v1103_v56 = vsel %vm1060_vm3, %v686_v59, %v1102_v53  ;;  %3851 = vst [vmem:[#allocation47_spill] sm:$0xff] %v2785_v54  ;;  %3852 = vst [vmem:[#allocation48_spill] sm:$0xff] %v2787_v51  ;;  %v2806_v31 = vld [vmem:[#allocation2 + $0x1a0] sm:$0xff]  ;;  %v2808_v63 = vld [vmem:[#allocation2 + $0x1b0] sm:$0xff] }
  0xba   :  { %3853 = vst [vmem:[#allocation49_spill] sm:$0xff] %v2789_v62  ;;  %v2793_v49 = vmul.f32 %v2709_v12, %v2703_v2  ;;  %v2797_v38 = vmul.f32 %v2711_v15, %v2705_v24  ;;  %v2801_v42 = vmul.f32 %v2713_v21, %v2707_v4  ;;  %v1104_v50 = vsel %vm1062_vm4, %v708_v46, %v1103_v56  ;;  %v2823_v60 = vld [vmem:[#allocation2 + $0x1c0] sm:$0xff]  ;;  %v2825_v37 = vld [vmem:[#allocation2 + $0x1d0] sm:$0xff] }
  0xbb   :  { %3854 = vst [vmem:[#allocation50_spill] sm:$0xff] %v2804_v28  ;;  %3855 = vst [vmem:[#allocation51_spill] sm:$0xff] %v2806_v31  ;;  %v2812_v33 = vmul.f32 %v2726_v44, %v2720_v22  ;;  %v2816_v26 = vmul.f32 %v2728_v13, %v2722_v25  ;;  %v2820_v8 = vmul.f32 %v2730_v30, %v2724_v6  ;;  %v2827_v59 = vld [vmem:[#allocation2 + $0x1e0] sm:$0xff]  ;;  %v2838_v48 = vld [vmem:[#allocation2 + $0x1f0] sm:$0xff] }
  0xbc   :  { %3856 = vst [vmem:[#allocation52_spill] sm:$0xff] %v2808_v63  ;;  %v1105_v17 = vsel %vm1064_vm5, %v730_v16, %v1104_v50  ;;  %3857 = vst [vmem:[#allocation53_spill] sm:$0xff] %v2823_v60  ;;  %v220_v46 = vmul.f32 %v2709_v12, %v2738_v18  ;;  %v222_v36 = vmul.f32 %v2711_v15, %v2740_v34  ;;  %v2840_v16 = vld [vmem:[#allocation2 + $0x200] sm:$0xff]  ;;  %v2842_v53 = vld [vmem:[#allocation2 + $0x210] sm:$0xff] }
  0xbd   :  { %3858 = vst [vmem:[#allocation54_spill] sm:$0xff] %v2825_v37  ;;  %3859 = vst [vmem:[#allocation55_spill] sm:$0xff] %v2827_v59  ;;  %v224_v47 = vmul.f32 %v2713_v21, %v2742_v55  ;;  %v2836_v14 = vsel %vm1066_vm6, %v752_v35, %v1105_v17  ;;  %v2846_v56 = vmul.f32 %v2726_v44, %v2745_v23  ;;  %v2856_v35 = vld [vmem:[#allocation2 + $0x220] sm:$0xff]  ;;  %v2858_v17 = vld [vmem:[#allocation2 + $0x230] sm:$0xff] }
  0xbe   :  { %3860 = vst [vmem:[#allocation56_spill] sm:$0xff] %v2838_v48  ;;  %3861 = vst [vmem:[#allocation57_spill] sm:$0xff] %v2840_v16  ;;  %v2850_v50 = vmul.f32 %v2728_v13, %v2747_v29  ;;  %v2854_v55 = vmul.f32 %v2730_v30, %v2749_v32  ;;  %v2860_v34 = vld [vmem:[#allocation2 + $0x240] sm:$0xff]  ;;  %v232_v18 = vmul.f32 %v2709_v12, %v2764_v52  ;;  %v2870_v32 = vld [vmem:[#allocation2 + $0x250] sm:$0xff] }
  0xbf   :  { %3862 = vst [vmem:[#allocation58_spill] sm:$0xff] %v2842_v53  ;;  %3863 = vst [vmem:[#allocation59_spill] sm:$0xff] %v2856_v35  ;;  %v234_v23 = vmul.f32 %v2711_v15, %v2766_v11  ;;  %v236_v29 = vmul.f32 %v2713_v21, %v2768_v1  ;;  %v238_v6 = vmul.f32 %v2726_v44, %v2770_v20  ;;  %v2872_v25 = vld [vmem:[#allocation2 + $0x260] sm:$0xff]  ;;  %v2874_v22 = vld [vmem:[#allocation2 + $0x270] sm:$0xff] }
  0xc0   :  { %3864 = vst [vmem:[#allocation60_spill] sm:$0xff] %v2858_v17  ;;  %3865 = vst [vmem:[#allocation61_spill] sm:$0xff] %v2860_v34  ;;  %v2878_v4 = vmul.f32 %v2728_v13, %v2785_v54  ;;  %v2882_v52 = vmul.f32 %v2730_v30, %v2787_v51  ;;  %v244_v1 = vmul.f32 %v2709_v12, %v2789_v62  ;;  %v2888_v11 = vld [vmem:[#allocation2 + $0x280] sm:$0xff]  ;;  %v2890_v24 = vld [vmem:[#allocation2 + $0x290] sm:$0xff] }
  0xc1   :  { %3866 = vst [vmem:[#allocation62_spill] sm:$0xff] %v2870_v32  ;;  %3867 = vst [vmem:[#allocation63_spill] sm:$0xff] %v2872_v25  ;;  %v246_v20 = vmul.f32 %v2711_v15, %v2804_v28  ;;  %v2892_v2 = vld [vmem:[#allocation2 + $0x2a0] sm:$0xff]  ;;  %v248_v54 = vmul.f32 %v2713_v21, %v2806_v31  ;;  %v250_v19 = vmul.f32 %v2726_v44, %v2808_v63  ;;  %v2902_v45 = vld [vmem:[#allocation2 + $0x2b0] sm:$0xff] }
  0xc2   :  { %3868 = vst [vmem:[#allocation64_spill] sm:$0xff] %v2874_v22  ;;  %3869 = vst [vmem:[#allocation65_spill] sm:$0xff] %v2888_v11  ;;  %v252_v51 = vmul.f32 %v2728_v13, %v2823_v60  ;;  %v254_v62 = vmul.f32 %v2730_v30, %v2825_v37  ;;  %v2904_v28 = vld [vmem:[#allocation2 + $0x2c0] sm:$0xff]  ;;  %v2906_v0 = vld [vmem:[#allocation2 + $0x2d0] sm:$0xff]  ;;  %v256_v58 = vmul.f32 %v2709_v12, %v2827_v59 }
  0xc3   :  { %3870 = vst [vmem:[#allocation66_spill] sm:$0xff] %v2890_v24  ;;  %3871 = vst [vmem:[#allocation17_spill] sm:$0xff] %v2892_v2  ;;  %v258_v31 = vmul.f32 %v2711_v15, %v2838_v48  ;;  %v260_v63 = vmul.f32 %v2713_v21, %v2840_v16  ;;  %v262_v60 = vmul.f32 %v2726_v44, %v2842_v53  ;;  %v2916_v40 = vld [vmem:[#allocation2 + $0x2e0] sm:$0xff] }
  0xc4   :  { %3872 = vst [vmem:[#allocation19_spill] sm:$0xff] %v2902_v45  ;;  %3873 = vst [vmem:[#allocation18_spill] sm:$0xff] %v2904_v28  ;;  %v264_v37 = vmul.f32 %v2728_v13, %v2856_v35  ;;  %v266_v3 = vmul.f32 %v2730_v30, %v2858_v17  ;;  %v268_v59 = vmul.f32 %v2709_v12, %v2860_v34  ;;  %v2956_v34 = vld [vmem:[#allocation2 + $0x2f0] sm:$0xff] }
  0xc5   :  { %3874 = vst [vmem:[#allocation20_spill] sm:$0xff] %v2906_v0  ;;  %3875 = vst [vmem:[#allocation22_spill] sm:$0xff] %v2916_v40  ;;  %v270_v48 = vmul.f32 %v2711_v15, %v2870_v32  ;;  %v272_v16 = vmul.f32 %v2713_v21, %v2872_v25  ;;  %v274_v53 = vmul.f32 %v2726_v44, %v2874_v22 }
  0xc6   :  { %v2932_v43 = vmul.f32 %v2728_v13, %v2888_v11  ;;  %v280_v35 = vmul.f32 %v2709_v12, %v2892_v2  ;;  %v2938_v17 = vmul.f32 %v2730_v30, %v2890_v24  ;;  %v282_v32 = vmul.f32 %v2711_v15, %v2902_v45 }
  0xc7   :  { %v284_v25 = vmul.f32 %v2713_v21, %v2904_v28  ;;  %v2946_v22 = vmul.f32 %v2726_v44, %v2906_v0  ;;  %v2950_v11 = vmul.f32 %v2728_v13, %v2916_v40  ;;  %v292_v12 = vadd.f32 %v2757_v9, %v2753_v61 }
  0xc8   :  { %3876 = vst [vmem:[#allocation21_spill] sm:$0xff] %v2938_v17  ;;  %v314_v2 = vadd.f32 %v2797_v38, %v2793_v49  ;;  %v336_v24 = vadd.f32 %v222_v36, %v220_v46  ;;  %v358_v15 = vadd.f32 %v234_v23, %v232_v18  ;;  %v380_v45 = vadd.f32 %v246_v20, %v244_v1  ;;  %v3880_v1 = vld [vmem:[#allocation38_spill] sm:$0xff] }
  0xc9   :  { %3877 = vst [vmem:[#allocation68_spill] sm:$0xff] %v2950_v11  ;;  %v402_v21 = vadd.f32 %v258_v31, %v256_v58  ;;  %v424_v28 = vadd.f32 %v270_v48, %v268_v59  ;;  %v293_v44 = vadd.f32 %v292_v12, %v2761_v39  ;;  %v446_v13 = vadd.f32 %v282_v32, %v280_v35  ;;  %v3881_v31 = vld [vmem:[#allocation69_spill] sm:$0xff] }
  0xca   :  { %v315_v0 = vadd.f32 %v314_v2, %v2801_v42  ;;  %v337_v7 = vadd.f32 %v336_v24, %v224_v47  ;;  %v359_v40 = vadd.f32 %v358_v15, %v236_v29  ;;  %v381_v11 = vadd.f32 %v380_v45, %v248_v54  ;;  %v3879_v45 = vld [vmem:[#allocation37_spill] sm:$0xff] }
  0xcb   :  { %v403_v17 = vadd.f32 %v402_v21, %v260_v63  ;;  %v425_v61 = vadd.f32 %v424_v28, %v272_v16  ;;  %v2962_v9 = vmul.f32 %v2730_v30, %v2956_v34  ;;  %v294_v49 = vadd.f32 %v293_v44, %v2774_v10  ;;  %v2967_v23 = vpop.permute.xlu0 %1145 }
  0xcc   :  { %v316_v18 = vadd.f32 %v315_v0, %v2812_v33  ;;  %v338_v58 = vadd.f32 %v337_v7, %v2846_v56  ;;  %3878 = vst [vmem:[#allocation70_spill] sm:$0xff] %v2967_v23  ;;  %v360_v39 = vadd.f32 %v359_v40, %v238_v6  ;;  %v382_v2 = vadd.f32 %v381_v11, %v250_v19 }
  0xcd   :  { %v404_v24 = vadd.f32 %v403_v17, %v262_v60  ;;  %v447_v32 = vadd.f32 %v446_v13, %v284_v25  ;;  %v1180_v29 = vmul.f32 %v3879_v45, %v2967_v23  ;;  %v1182_v20 = vmul.f32 %v3880_v1, %v2967_v23 }
  0xce   :  { %v295_v30 = vadd.f32 %v294_v49, %v2778_v27  ;;  %v426_v54 = vadd.f32 %v425_v61, %v274_v53  ;;  %v317_v10 = vadd.f32 %v316_v18, %v2816_v26  ;;  %v339_v0 = vadd.f32 %v338_v58, %v2850_v50 }
  0xcf   :  { %v361_v7 = vadd.f32 %v360_v39, %v2878_v4  ;;  %v383_v38 = vadd.f32 %v382_v2, %v252_v51  ;;  %v1186_v40 = vadd.f32 %v1180_v29, %v2718_v57  ;;  %v1188_v19 = vadd.f32 %v1182_v20, %v2836_v14  ;;  %v3882_v61 = vld [vmem:[#allocation21_spill] sm:$0xff] }
  0xd0   :  { %v296_v25 = vadd.f32 %v295_v30, %v2782_v41  ;;  %v405_v6 = vadd.f32 %v404_v24, %v264_v37  ;;  %v318_v11 = vadd.f32 %v317_v10, %v2820_v8  ;;  %v340_v42 = vadd.f32 %v339_v0, %v2854_v55  ;;  %v3883_v18 = vld [vmem:[#allocation68_spill] sm:$0xff] }
  0xd1   :  { %v362_v27 = vadd.f32 %v361_v7, %v2882_v52  ;;  %v384_v28 = vadd.f32 %v383_v38, %v254_v62  ;;  %v1224_v63 = vadd.f32 %v3881_v31, %v1186_v40  ;;  %v1226_v33 = vadd.f32 %v2736_v5, %v1188_v19  ;;  %v2992_v19 = vld [vmem:[#allocation5 + $0x70] sm:$0xff]  ;;  %v3887_v31 = vld [vmem:[#allocation67_spill] sm:$0xff] }
  0xd2   :  { %v297_v4 = vrot.slane %v296_v25, 4  ;;  %v406_v51 = vadd.f32 %v405_v6, %v266_v3  ;;  %v319_v26 = vrot.slane %v318_v11, 4  ;;  %v341_v57 = vrot.slane %v340_v42, 4  ;;  %v2996_v6 = vld [vmem:[#allocation5 + $0x90] sm:$0xff] }
  0xd3   :  { %v363_v60 = vrot.slane %v362_v27, 4  ;;  %v385_v59 = vrot.slane %v384_v28, 4  ;;  %vm1230_vm7 = vcmp.gt.f32.partialorder %v1224_v63, 0.0  ;;  %v1236_v41 = vmul.f32 0.01, %v1224_v63 }
  0xd4   :  { %vm1232_vm8 = vcmp.gt.f32.partialorder %v1226_v33, 0.0  ;;  %v1238_v37 = vmul.f32 0.01, %v1226_v33  ;;  %v298_v8 = vadd.f32 %v297_v4, %v296_v25  ;;  %v320_v46 = vadd.f32 %v319_v26, %v318_v11  ;;  %v2994_v25 = vld [vmem:[#allocation5 + $0x80] sm:$0xff]  ;;  %v3888_v4 = vld [vmem:[#allocation23_spill] sm:$0xff] }
  0xd5   :  { %v342_v55 = vadd.f32 %v341_v57, %v340_v42  ;;  %v364_v36 = vadd.f32 %v363_v60, %v362_v27  ;;  %v1242_v52 = vsel %vm1230_vm7, %v1224_v63, %v1236_v41  ;;  %v386_v47 = vadd.f32 %v385_v59, %v384_v28  ;;  %v3885_v27 = vld [vmem:[#allocation15_spill] sm:$0xff]  ;;  %v3011_v41 = vld [vmem:[#allocation5 + $0xb0] sm:$0xff] }
  0xd6   :  { %v1244_v62 = vsel %vm1232_vm8, %v1226_v33, %v1238_v37  ;;  %v407_v14 = vrot.slane %v406_v51, 4  ;;  %1414 = vmatprep.mubr.f32.mxu0 %v1242_v52  ;;  %v299_v5 = vrot.slane %v298_v8, 2  ;;  %v321_v3 = vrot.slane %v320_v46, 2  ;;  %v3004_v33 = vld [vmem:[#allocation5 + $0xa0] sm:$0xff] }
  0xd7   :  { %1484 = vmatprep.mubr.f32.mxu1 %v1244_v62  ;;  %v343_v48 = vrot.slane %v342_v55, 2  ;;  %v365_v16 = vrot.slane %v364_v36, 2  ;;  %v387_v53 = vrot.slane %v386_v47, 2  ;;  %v427_v50 = vadd.f32 %v426_v54, %v2932_v43  ;;  %v3891_v52 = vld [vmem:[#allocation26_spill] sm:$0xff] }
  0xd8   :  { %v408_v56 = vadd.f32 %v407_v14, %v406_v51  ;;  %v448_v35 = vadd.f32 %v447_v32, %v2946_v22  ;;  %v300_v17 = vadd.f32 %v299_v5, %v298_v8  ;;  %v322_v12 = vadd.f32 %v321_v3, %v320_v46  ;;  %v2990_v22 = vld [vmem:[#allocation5 + $0x60] sm:$0xff]  ;;  %v3889_v8 = vld [vmem:[#allocation24_spill] sm:$0xff]  ;;  %v3892_v3 = vld [vmem:[#allocation27_spill] sm:$0xff] }
  0xd9   :  { %v344_v15 = vadd.f32 %v343_v48, %v342_v55  ;;  %v366_v21 = vadd.f32 %v365_v16, %v364_v36  ;;  %v388_v44 = vadd.f32 %v387_v53, %v386_v47  ;;  %v428_v49 = vadd.f32 %v427_v50, %v3882_v61  ;;  %v3890_v55 = vld [vmem:[#allocation25_spill] sm:$0xff]  ;;  %v3893_v53 = vld [vmem:[#allocation28_spill] sm:$0xff] }
  0xda   :  { %v409_v13 = vrot.slane %v408_v56, 2  ;;  %v449_v58 = vadd.f32 %v448_v35, %v3883_v18  ;;  %v301_v39 = vrot.slane %v300_v17, 1  ;;  %v323_v2 = vrot.slane %v322_v12, 1  ;;  %v3894_v50 = vld [vmem:[#allocation29_spill] sm:$0xff]  ;;  %v3897_v61 = vld [vmem:[#allocation32_spill] sm:$0xff] }
  0xdb   :  { %v345_v24 = vrot.slane %v344_v15, 1  ;;  %v367_v45 = vrot.slane %v366_v21, 1  ;;  %v389_v29 = vrot.slane %v388_v44, 1  ;;  %v429_v20 = vrot.slane %v428_v49, 4  ;;  %v3898_v18 = vld [vmem:[#allocation33_spill] sm:$0xff] }
  0xdc   :  { %v410_v1 = vadd.f32 %v409_v13, %v408_v56  ;;  %v450_v43 = vadd.f32 %v449_v58, %v2962_v9  ;;  %v302_v32 = vadd.f32 %v301_v39, %v300_v17  ;;  %v324_v30 = vadd.f32 %v323_v2, %v322_v12  ;;  %v3884_v9 = vld [vmem:[#allocation16_spill] sm:$0xff]  ;;  %v3895_v17 = vld [vmem:[#allocation30_spill] sm:$0xff] }
  0xdd   :  { %v346_v54 = vadd.f32 %v345_v24, %v344_v15  ;;  %v368_v10 = vadd.f32 %v367_v45, %v366_v21  ;;  %v390_v0 = vadd.f32 %v389_v29, %v388_v44  ;;  %v430_v38 = vadd.f32 %v429_v20, %v428_v49  ;;  %v3896_v44 = vld [vmem:[#allocation31_spill] sm:$0xff]  ;;  %v3899_v39 = vld [vmem:[#allocation34_spill] sm:$0xff]  ;;  %v3902_v29 = vld [vmem:[#allocation36_spill] sm:$0xff] }
  0xde   :  { %v411_v7 = vrot.slane %v410_v1, 1  ;;  %v451_v40 = vrot.slane %v450_v43, 4  ;;  %v1055_v11 = vsel %vm1054_vm0, %v324_v30, %v302_v32  ;;  %v1179_v42 = vmul.f32 %v3884_v9, %v2967_v23  ;;  %v3901_v24 = vld [vmem:[#allocation35_spill] sm:$0xff] }
  0xdf   :  { %v3886_v28 = vsub.s32 0, %v3885_v27  ;;  %v3008_v51 = vmul.f32 %v2990_v22, %v3888_v4  ;;  %v431_v57 = vrot.slane %v430_v38, 2  ;;  %v1057_v59 = vsel %vm1056_vm1, %v346_v54, %v1055_v11  ;;  %v3903_v32 = vld [vmem:[#allocation39_spill] sm:$0xff]  ;;  %v3904_v54 = vld [vmem:[#allocation40_spill] sm:$0xff] }
  0xe0   :  { %v412_v26 = vadd.f32 %v411_v7, %v410_v1  ;;  %v452_v60 = vadd.f32 %v451_v40, %v450_v43  ;;  %v1059_v37 = vsel %vm1058_vm2, %v368_v10, %v1057_v59  ;;  %v483_v46 = vmul.f32 %v2992_v19, %v3889_v8  ;;  %v3908_v11 = vld [vmem:[#allocation43_spill] sm:$0xff]  ;;  %v3911_v59 = vld [vmem:[#allocation46_spill] sm:$0xff] }
  0xe1   :  { %v1196_v63 = vrot.slane %v3887_v31, %v3886_v28  ;;  %v3018_v36 = vmul.f32 %v2994_v25, %v3890_v55  ;;  %v3022_v62 = vmul.f32 %v2996_v6, %v3891_v52  ;;  %v432_v47 = vadd.f32 %v431_v57, %v430_v38  ;;  %v3906_v38 = vld [vmem:[#allocation42_spill] sm:$0xff]  ;;  %v3909_v28 = vld [vmem:[#allocation44_spill] sm:$0xff]  ;;  %v3910_v57 = vld [vmem:[#allocation45_spill] sm:$0xff] }
  0xe2   :  { %v453_v14 = vrot.slane %v452_v60, 2  ;;  %v1061_v5 = vsel %vm1060_vm3, %v390_v0, %v1059_v37  ;;  %v3027_v48 = vmul.f32 %v3004_v33, %v3892_v3  ;;  %v3032_v56 = vmul.f32 %v3011_v41, %v3893_v53  ;;  %v3905_v0 = vld [vmem:[#allocation41_spill] sm:$0xff]  ;;  %v3912_v8 = vld [vmem:[#allocation47_spill] sm:$0xff]  ;;  %v3913_v52 = vld [vmem:[#allocation48_spill] sm:$0xff] }
  0xe3   :  { %v1063_v16 = vsel %vm1062_vm4, %v412_v26, %v1061_v5  ;;  %v493_v35 = vmul.f32 %v2990_v22, %v3894_v50  ;;  %v495_v12 = vmul.f32 %v2992_v19, %v3895_v17  ;;  %v433_v15 = vrot.slane %v432_v47, 1  ;;  %v3916_v3 = vld [vmem:[#allocation50_spill] sm:$0xff]  ;;  %v3917_v50 = vld [vmem:[#allocation51_spill] sm:$0xff] }
  0xe4   :  { %v454_v21 = vadd.f32 %v453_v14, %v452_v60  ;;  %v497_v13 = vmul.f32 %v2994_v25, %v3896_v44  ;;  %v3042_v49 = vmul.f32 %v2996_v6, %v3897_v61  ;;  %v3046_v58 = vmul.f32 %v3004_v33, %v3898_v18  ;;  %v3915_v14 = vld [vmem:[#allocation49_spill] sm:$0xff] }
  0xe5   :  { %v3050_v2 = vmul.f32 %v3011_v41, %v3899_v39  ;;  %v505_v45 = vmul.f32 %v2990_v22, %v3901_v24  ;;  %v507_v1 = vmul.f32 %v2992_v19, %v3902_v29  ;;  %v434_v20 = vadd.f32 %v433_v15, %v432_v47  ;;  %v3918_v15 = vld [vmem:[#allocation52_spill] sm:$0xff]  ;;  %v3919_v44 = vld [vmem:[#allocation53_spill] sm:$0xff]  ;;  %v3920_v39 = vld [vmem:[#allocation54_spill] sm:$0xff] }
  0xe6   :  { %v455_v43 = vrot.slane %v454_v21, 1  ;;  %v509_v30 = vmul.f32 %v2994_v25, %v3903_v32  ;;  %v511_v10 = vmul.f32 %v2996_v6, %v3904_v54  ;;  %v3062_v7 = vmul.f32 %v3004_v33, %v3905_v0  ;;  %v3921_v29 = vld [vmem:[#allocation55_spill] sm:$0xff]  ;;  %v3923_v54 = vld [vmem:[#allocation57_spill] sm:$0xff] }
  0xe7   :  { %3900 = vst [vmem:[#allocation37_spill] sm:$0xff] %v3050_v2  ;;  %v3066_v40 = vmul.f32 %v3011_v41, %v3906_v38  ;;  %v517_v9 = vmul.f32 %v2990_v22, %v3908_v11  ;;  %v519_v31 = vmul.f32 %v2992_v19, %v3909_v28  ;;  %v1065_v26 = vsel %vm1064_vm5, %v434_v20, %v1063_v16  ;;  %v3924_v38 = vld [vmem:[#allocation58_spill] sm:$0xff]  ;;  %v3925_v28 = vld [vmem:[#allocation59_spill] sm:$0xff] }
  0xe8   :  { %v456_v4 = vadd.f32 %v455_v43, %v454_v21  ;;  %v521_v60 = vmul.f32 %v2994_v25, %v3910_v57  ;;  %v523_v37 = vmul.f32 %v2996_v6, %v3911_v59  ;;  %v525_v55 = vmul.f32 %v3004_v33, %v3912_v8  ;;  %v3922_v43 = vld [vmem:[#allocation56_spill] sm:$0xff]  ;;  %v3927_v59 = vld [vmem:[#allocation61_spill] sm:$0xff] }
  0xe9   :  { %3907 = vst [vmem:[#allocation38_spill] sm:$0xff] %v3066_v40  ;;  %v3081_v47 = vmul.f32 %v3011_v41, %v3913_v52  ;;  %v529_v5 = vmul.f32 %v2990_v22, %v3915_v14  ;;  %v531_v53 = vmul.f32 %v2992_v19, %v3916_v3  ;;  %v533_v17 = vmul.f32 %v2994_v25, %v3917_v50  ;;  %v3928_v52 = vld [vmem:[#allocation62_spill] sm:$0xff]  ;;  %v3929_v3 = vld [vmem:[#allocation63_spill] sm:$0xff]  ;;  %v3930_v50 = vld [vmem:[#allocation64_spill] sm:$0xff] }
  0xea   :  { %v1067_v16 = vsel %vm1066_vm6, %v456_v4, %v1065_v26  ;;  %v535_v21 = vmul.f32 %v2996_v6, %v3918_v15  ;;  %v537_v61 = vmul.f32 %v3004_v33, %v3919_v44  ;;  %v539_v24 = vmul.f32 %v3011_v41, %v3920_v39  ;;  %v3926_v26 = vld [vmem:[#allocation60_spill] sm:$0xff]  ;;  %v3931_v44 = vld [vmem:[#allocation65_spill] sm:$0xff] }
  0xeb   :  { %3914 = vst [vmem:[#allocation69_spill] sm:$0xff] %v3081_v47  ;;  %v1185_v18 = vadd.f32 %v1179_v42, %v1067_v16  ;;  %v541_v20 = vmul.f32 %v2990_v22, %v3921_v29  ;;  %v543_v32 = vmul.f32 %v2992_v19, %v3922_v43  ;;  %v545_v0 = vmul.f32 %v2994_v25, %v3923_v54  ;;  %v3932_v29 = vld [vmem:[#allocation66_spill] sm:$0xff]  ;;  %v3933_v54 = vld [vmem:[#allocation17_spill] sm:$0xff] }
  0xec   :  { %v547_v11 = vmul.f32 %v2996_v6, %v3924_v38  ;;  %v549_v4 = vmul.f32 %v3004_v33, %v3925_v28  ;;  %v551_v42 = vmul.f32 %v3011_v41, %v3926_v26  ;;  %v553_v8 = vmul.f32 %v2990_v22, %v3927_v59  ;;  %v3934_v38 = vld [vmem:[#allocation19_spill] sm:$0xff]  ;;  %v3935_v26 = vld [vmem:[#allocation18_spill] sm:$0xff] }
  0xed   :  { %v1223_v57 = vadd.f32 %v1196_v63, %v1185_v18  ;;  %v555_v14 = vmul.f32 %v2992_v19, %v3928_v52  ;;  %v557_v16 = vmul.f32 %v2994_v25, %v3929_v3  ;;  %v559_v15 = vmul.f32 %v2996_v6, %v3930_v50  ;;  %v3936_v52 = vld [vmem:[#allocation20_spill] sm:$0xff]  ;;  %v3937_v50 = vld [vmem:[#allocation22_spill] sm:$0xff] }
  0xee   :  { %v561_v39 = vmul.f32 %v3004_v33, %v3931_v44  ;;  %v563_v43 = vmul.f32 %v3011_v41, %v3932_v29  ;;  %v565_v63 = vmul.f32 %v2990_v22, %v3933_v54  ;;  %v567_v28 = vmul.f32 %v2992_v19, %v3934_v38 }
  0xef   :  { %vm1229_vm9 = vcmp.gt.f32.partialorder %v1223_v57, 0.0  ;;  %v1235_v18 = vmul.f32 0.01, %v1223_v57  ;;  %v569_v59 = vmul.f32 %v2994_v25, %v3935_v26  ;;  %v571_v3 = vmul.f32 %v2996_v6, %v3936_v52 }
  0xf0   :  { %v573_v44 = vmul.f32 %v3004_v33, %v3937_v50  ;;  %v575_v29 = vmul.f32 %v3011_v41, %v2956_v34  ;;  %v577_v23 = vadd.f32 %v483_v46, %v3008_v51  ;;  %v599_v54 = vadd.f32 %v495_v12, %v493_v35 }
  0xf1   :  { %v1241_v22 = vsel %vm1229_vm9, %v1223_v57, %v1235_v18  ;;  %v621_v27 = vadd.f32 %v507_v1, %v505_v45  ;;  %v643_v47 = vadd.f32 %v519_v31, %v517_v9  ;;  %v665_v38 = vadd.f32 %v531_v53, %v529_v5 }
  0xf2   :  { %1415 = vmatmul.mubr.f32.vlgmr.msra.gmra.mrb[0].mxu0 %v1241_v22  ;;  %v578_v19 = vadd.f32 %v577_v23, %v3018_v36  ;;  %v687_v25 = vadd.f32 %v543_v32, %v541_v20  ;;  %v709_v26 = vadd.f32 %v555_v14, %v553_v8  ;;  %v600_v40 = vadd.f32 %v599_v54, %v497_v13 }
  0xf3   :  { %v622_v6 = vadd.f32 %v621_v27, %v509_v30  ;;  %v644_v52 = vadd.f32 %v643_v47, %v521_v60  ;;  %v731_v2 = vadd.f32 %v567_v28, %v565_v63  ;;  %v666_v50 = vadd.f32 %v665_v38, %v533_v17 }
  0xf4   :  { %v579_v33 = vadd.f32 %v578_v19, %v3022_v62  ;;  %v688_v34 = vadd.f32 %v687_v25, %v545_v0  ;;  %v710_v41 = vadd.f32 %v709_v26, %v557_v16  ;;  %v601_v51 = vadd.f32 %v600_v40, %v3042_v49  ;;  %v3938_v49 = vld [vmem:[#allocation37_spill] sm:$0xff]  ;;  %v3939_v40 = vld [vmem:[#allocation38_spill] sm:$0xff] }
  0xf5   :  { %v623_v46 = vadd.f32 %v622_v6, %v511_v10  ;;  %v645_v35 = vadd.f32 %v644_v52, %v523_v37  ;;  %v732_v12 = vadd.f32 %v731_v2, %v569_v59  ;;  %v667_v23 = vadd.f32 %v666_v50, %v535_v21  ;;  %v3940_v37 = vld [vmem:[#allocation69_spill] sm:$0xff] }
  0xf6   :  { %v580_v45 = vadd.f32 %v579_v33, %v3027_v48  ;;  %v689_v36 = vadd.f32 %v688_v34, %v547_v11  ;;  %v711_v1 = vadd.f32 %v710_v41, %v559_v15  ;;  %v602_v13 = vadd.f32 %v601_v51, %v3046_v58 }
  0xf7   :  { %v624_v27 = vadd.f32 %v623_v46, %v3062_v7  ;;  %v646_v30 = vadd.f32 %v645_v35, %v525_v55  ;;  %v733_v9 = vadd.f32 %v732_v12, %v571_v3  ;;  %v668_v31 = vadd.f32 %v667_v23, %v537_v61  ;;  %v1311_v12 = vld [vmem:[#allocation7 + $0x200] sm:$0xff]  ;;  %v3143_v23 = vld [vmem:[#allocation5 + $0xc8] sm:$0xff] }
  0xf8   :  { %v581_v62 = vadd.f32 %v580_v45, %v3032_v56  ;;  %v690_v60 = vadd.f32 %v689_v36, %v549_v4  ;;  %v712_v47 = vadd.f32 %v711_v1, %v561_v39  ;;  %v603_v10 = vadd.f32 %v602_v13, %v3938_v49  ;;  %v1312_v45 = vld [vmem:[#allocation7 + $0x208] sm:$0xff] }
  0xf9   :  { %v625_v2 = vadd.f32 %v624_v27, %v3939_v40  ;;  %v647_v48 = vadd.f32 %v646_v30, %v3940_v37  ;;  %v734_v5 = vadd.f32 %v733_v9, %v573_v44  ;;  %v669_v17 = vadd.f32 %v668_v31, %v539_v24  ;;  %v3145_v30 = vld [vmem:[#allocation5 + $0xd8] sm:$0xff]  ;;  %v3148_v49 = vld [vmem:[#allocation5 + $0xe8] sm:$0xff] }
  0xfa   :  { %v582_v53 = vrot.slane %v581_v62, 4  ;;  %v691_v21 = vadd.f32 %v690_v60, %v551_v42  ;;  %v713_v58 = vadd.f32 %v712_v47, %v563_v43  ;;  %v604_v20 = vrot.slane %v603_v10, 4  ;;  %v3941_v60 = vld [vmem:[#allocation15_spill] sm:$0xff] }
  0xfb   :  { %v626_v7 = vrot.slane %v625_v2, 4  ;;  %v648_v55 = vrot.slane %v647_v48, 4  ;;  %v735_v32 = vadd.f32 %v734_v5, %v575_v29  ;;  %v670_v56 = vrot.slane %v669_v17, 4  ;;  %v3152_v40 = vld [vmem:[#allocation5 + $0x108] sm:$0xff]  ;;  %v3155_v5 = vld [vmem:[#allocation5 + $0x118] sm:$0xff] }
  0xfc   :  { %v583_v0 = vadd.f32 %v582_v53, %v581_v62  ;;  %v692_v61 = vrot.slane %v691_v21, 4  ;;  %v714_v11 = vrot.slane %v713_v58, 4  ;;  %v605_v4 = vadd.f32 %v604_v20, %v603_v10  ;;  %v3150_v10 = vld [vmem:[#allocation5 + $0xf8] sm:$0xff]  ;;  %v1980_v53 = vld [vmem:[#allocation2 + $0x8] sm:$0xff] }
  0xfd   :  { %v627_v57 = vadd.f32 %v626_v7, %v625_v2  ;;  %v649_v8 = vadd.f32 %v648_v55, %v647_v48  ;;  %v736_v14 = vrot.slane %v735_v32, 4  ;;  %v671_v15 = vadd.f32 %v670_v56, %v669_v17  ;;  %v3170_v7 = vld [vmem:[%s3590_s4] sm:$0x3f] }
  0xfe   :  { %v584_v16 = vrot.slane %v583_v0, 2  ;;  %v693_v39 = vadd.f32 %v692_v61, %v691_v21  ;;  %v715_v63 = vadd.f32 %v714_v11, %v713_v58  ;;  %v606_v18 = vrot.slane %v605_v4, 2  ;;  %v3164_v58 = vld [vmem:[%s3589_s3] sm:$0x3f]  ;;  %3943 = vst [vmem:[#allocation68_spill] sm:$0xff] %v3170_v7  ;;  %v1984_v61 = vld [vmem:[#allocation2 + $0x28] sm:$0xff] }
  0xff   :  { %v628_v24 = vrot.slane %v627_v57, 2  ;;  %v650_v42 = vrot.slane %v649_v8, 2  ;;  %v737_v43 = vadd.f32 %v736_v14, %v735_v32  ;;  %v672_v59 = vrot.slane %v671_v15, 2  ;;  %3942 = vst [vmem:[#allocation21_spill] sm:$0xff] %v3164_v58  ;;  %v1983_v32 = vld [vmem:[#allocation2 + $0x18] sm:$0xff] }
 0x100   :  { %v585_v28 = vadd.f32 %v584_v16, %v583_v0  ;;  %v694_v3 = vrot.slane %v693_v39, 2  ;;  %v716_v44 = vrot.slane %v715_v63, 2  ;;  %v607_v29 = vadd.f32 %v606_v18, %v605_v4  ;;  %v1985_v4 = vld [vmem:[#allocation2 + $0x38] sm:$0xff] }
 0x101   :  { %v629_v22 = vadd.f32 %v628_v24, %v627_v57  ;;  %v651_v54 = vadd.f32 %v650_v42, %v649_v8  ;;  %v738_v19 = vrot.slane %v737_v43, 2  ;;  %v673_v25 = vadd.f32 %v672_v59, %v671_v15  ;;  %v1986_v8 = vld [vmem:[#allocation2 + $0x48] sm:$0xff]  ;;  %v3944_v15 = vld [vmem:[#allocation70_spill] sm:$0xff] }
 0x102   :  { %v586_v38 = vrot.slane %v585_v28, 1  ;;  %v695_v26 = vadd.f32 %v694_v3, %v693_v39  ;;  %v717_v6 = vadd.f32 %v716_v44, %v715_v63  ;;  %v608_v52 = vrot.slane %v607_v29, 1  ;;  %v1987_v63 = vld [vmem:[#allocation2 + $0x58] sm:$0xff]  ;;  %v1988_v24 = vld [vmem:[#allocation2 + $0x68] sm:$0xff] }
 0x103   :  { %v630_v33 = vrot.slane %v629_v22, 1  ;;  %v652_v50 = vrot.slane %v651_v54, 1  ;;  %v739_v34 = vadd.f32 %v738_v19, %v737_v43  ;;  %v674_v51 = vrot.slane %v673_v25, 1  ;;  %v1990_v3 = vld [vmem:[#allocation2 + $0x88] sm:$0xff] }
 0x104   :  { %v587_v41 = vadd.f32 %v586_v38, %v585_v28  ;;  %v696_v46 = vrot.slane %v695_v26, 1  ;;  %v718_v35 = vrot.slane %v717_v6, 1  ;;  %v609_v36 = vadd.f32 %v608_v52, %v607_v29  ;;  %v1989_v28 = vld [vmem:[#allocation2 + $0x78] sm:$0xff]  ;;  %v1992_v19 = vld [vmem:[#allocation2 + $0xa8] sm:$0xff] }
 0x105   :  { %v631_v1 = vadd.f32 %v630_v33, %v629_v22  ;;  %v653_v13 = vadd.f32 %v652_v50, %v651_v54  ;;  %v740_v27 = vrot.slane %v739_v34, 1  ;;  %v675_v9 = vadd.f32 %v674_v51, %v673_v25  ;;  %v1991_v29 = vld [vmem:[#allocation2 + $0x98] sm:$0xff] }
 0x106   :  { %v697_v62 = vadd.f32 %v696_v46, %v695_v26  ;;  %v719_v31 = vadd.f32 %v718_v35, %v717_v6  ;;  %v1159_v47 = vsub.s32 2, %v3941_v60  ;;  %v1093_v37 = vsel %vm1054_vm0, %v609_v36, %v587_v41  ;;  %v1993_v25 = vld [vmem:[#allocation2 + $0xb8] sm:$0xff]  ;;  %v1994_v6 = vld [vmem:[#allocation2 + $0xc8] sm:$0xff] }
 0x107   :  { %v741_v2 = vadd.f32 %v740_v27, %v739_v34  ;;  %v1908_v48 = vpack.c.bf16 %v1312_v45, %v1311_v12  ;;  %v3158_v17 = vmul.f32 %v1980_v53, %v3143_v23  ;;  %v1094_v21 = vsel %vm1056_vm1, %v631_v1, %v1093_v37  ;;  %v1995_v50 = vld [vmem:[#allocation2 + $0xd8] sm:$0xff]  ;;  %v1996_v41 = vld [vmem:[#allocation2 + $0xe8] sm:$0xff] }
 0x108   :  { %v1160_v20 = vrot.slane %v3164_v58, %v1159_v47  ;;  %v1204_v55 = vrot.slane %v3170_v7, %v1159_v47  ;;  %v3174_v0 = vmul.f32 %v1983_v32, %v3145_v30  ;;  %v1095_v56 = vsel %vm1058_vm2, %v653_v13, %v1094_v21  ;;  %v1997_v46 = vld [vmem:[#allocation2 + $0xf8] sm:$0xff]  ;;  %v1998_v45 = vld [vmem:[#allocation2 + $0x108] sm:$0xff] }
 0x109   :  { %1909 = vmatpush3.bf16.msra.mxu0 %v1908_v48  ;;  %v3178_v11 = vmul.f32 %v1984_v61, %v3148_v49  ;;  %v3181_v57 = vmul.f32 %v1985_v4, %v3150_v10  ;;  %v3184_v14 = vmul.f32 %v1986_v8, %v3152_v40  ;;  %v1096_v16 = vsel %vm1060_vm3, %v675_v9, %v1095_v56  ;;  %v1999_v1 = vld [vmem:[#allocation2 + $0x118] sm:$0xff]  ;;  %v2000_v27 = vld [vmem:[#allocation2 + $0x128] sm:$0xff] }
 0x10a   :  { %v1181_v39 = vmul.f32 %v1160_v20, %v3944_v15  ;;  %v3189_v18 = vmul.f32 %v1987_v63, %v3155_v5  ;;  %v3192_v42 = vmul.f32 %v1988_v24, %v3143_v23  ;;  %v1097_v43 = vsel %vm1062_vm4, %v697_v62, %v1096_v16  ;;  %v2001_v62 = vld [vmem:[#allocation2 + $0x138] sm:$0xff]  ;;  %v2002_v47 = vld [vmem:[#allocation2 + $0x148] sm:$0xff] }
 0x10b   :  { %v3196_v59 = vmul.f32 %v1989_v28, %v3145_v30  ;;  %v3199_v44 = vmul.f32 %v1990_v3, %v3148_v49  ;;  %v3202_v22 = vmul.f32 %v1991_v29, %v3150_v10  ;;  %v1098_v54 = vsel %vm1064_vm5, %v719_v31, %v1097_v43  ;;  %v2003_v37 = vld [vmem:[#allocation2 + $0x158] sm:$0xff]  ;;  %v2004_v53 = vld [vmem:[#allocation2 + $0x168] sm:$0xff] }
 0x10c   :  { %v3206_v38 = vmul.f32 %v1992_v19, %v3152_v40  ;;  %v3209_v26 = vmul.f32 %v1993_v25, %v3155_v5  ;;  %v3212_v52 = vmul.f32 %v1994_v6, %v3143_v23  ;;  %v1099_v33 = vsel %vm1066_vm6, %v741_v2, %v1098_v54  ;;  %v2005_v32 = vld [vmem:[#allocation2 + $0x178] sm:$0xff]  ;;  %v2006_v61 = vld [vmem:[#allocation2 + $0x188] sm:$0xff] }
 0x10d   :  { %v3216_v34 = vmul.f32 %v1995_v50, %v3145_v30  ;;  %v3219_v51 = vmul.f32 %v1996_v41, %v3148_v49  ;;  %v3222_v35 = vmul.f32 %v1997_v46, %v3150_v10  ;;  %v1187_v12 = vadd.f32 %v1181_v39, %v1099_v33  ;;  %v2007_v8 = vld [vmem:[#allocation2 + $0x198] sm:$0xff]  ;;  %v2008_v39 = vld [vmem:[#allocation2 + $0x1a8] sm:$0xff] }
 0x10e   :  { %v3225_v36 = vmul.f32 %v1998_v45, %v3152_v40  ;;  %v3228_v13 = vmul.f32 %v1999_v1, %v3155_v5  ;;  %v3231_v9 = vmul.f32 %v2000_v27, %v3143_v23  ;;  %v3234_v31 = vmul.f32 %v2001_v62, %v3145_v30  ;;  %v2009_v24 = vld [vmem:[#allocation2 + $0x1b8] sm:$0xff]  ;;  %v2010_v28 = vld [vmem:[#allocation2 + $0x1c8] sm:$0xff] }
 0x10f   :  { %v3237_v2 = vmul.f32 %v2002_v47, %v3148_v49  ;;  %v3240_v48 = vmul.f32 %v2003_v37, %v3150_v10  ;;  %v3243_v21 = vmul.f32 %v2004_v53, %v3152_v40  ;;  %v1225_v20 = vadd.f32 %v1204_v55, %v1187_v12  ;;  %v2011_v3 = vld [vmem:[#allocation2 + $0x1d8] sm:$0xff]  ;;  %v2012_v19 = vld [vmem:[#allocation2 + $0x1e8] sm:$0xff] }
 0x110   :  { %v3246_v56 = vmul.f32 %v2005_v32, %v3155_v5  ;;  %v815_v4 = vmul.f32 %v2006_v61, %v3143_v23  ;;  %v817_v16 = vmul.f32 %v2007_v8, %v3145_v30  ;;  %v819_v63 = vmul.f32 %v2008_v39, %v3148_v49  ;;  %v2013_v6 = vld [vmem:[#allocation2 + $0x1f8] sm:$0xff]  ;;  %v2014_v50 = vld [vmem:[#allocation2 + $0x208] sm:$0xff] }
 0x111   :  { %v3252_v43 = vmul.f32 %v2009_v24, %v3150_v10  ;;  %v3255_v55 = vmul.f32 %v2010_v28, %v3152_v40  ;;  %v3258_v29 = vmul.f32 %v2011_v3, %v3155_v5  ;;  %vm1231_vm10 = vcmp.gt.f32.partialorder %v1225_v20, 0.0  ;;  %v2015_v46 = vld [vmem:[#allocation2 + $0x218] sm:$0xff]  ;;  %v2016_v45 = vld [vmem:[#allocation2 + $0x228] sm:$0xff] }
 0x112   :  { %v1237_v54 = vmul.f32 0.01, %v1225_v20  ;;  %v827_v25 = vmul.f32 %v2012_v19, %v3143_v23  ;;  %v829_v33 = vmul.f32 %v2013_v6, %v3145_v30  ;;  %v831_v41 = vmul.f32 %v2014_v50, %v3148_v49  ;;  %v2017_v27 = vld [vmem:[#allocation2 + $0x238] sm:$0xff]  ;;  %v2018_v37 = vld [vmem:[#allocation2 + $0x248] sm:$0xff] }
 0x113   :  { %v833_v12 = vmul.f32 %v2015_v46, %v3150_v10  ;;  %v835_v1 = vmul.f32 %v2016_v45, %v3152_v40  ;;  %v3266_v62 = vmul.f32 %v2017_v27, %v3155_v5  ;;  %v839_v53 = vmul.f32 %v2018_v37, %v3143_v23  ;;  %v2019_v32 = vld [vmem:[#allocation2 + $0x258] sm:$0xff]  ;;  %v2020_v8 = vld [vmem:[#allocation2 + $0x268] sm:$0xff] }
 0x114   :  { %v1243_v47 = vsel %vm1231_vm10, %v1225_v20, %v1237_v54  ;;  %v841_v61 = vmul.f32 %v2019_v32, %v3145_v30  ;;  %v843_v39 = vmul.f32 %v2020_v8, %v3148_v49  ;;  %v2021_v24 = vld [vmem:[#allocation2 + $0x278] sm:$0xff]  ;;  %v2022_v3 = vld [vmem:[#allocation2 + $0x288] sm:$0xff] }
 0x115   :  { %1485 = vmatmul.mubr.f32.vlgmr.msra.gmra.mrb[0].mxu1 %v1243_v47  ;;  %v845_v28 = vmul.f32 %v2021_v24, %v3150_v10  ;;  %v847_v19 = vmul.f32 %v2022_v3, %v3152_v40  ;;  %v2023_v6 = vld [vmem:[#allocation2 + $0x298] sm:$0xff]  ;;  %v2024_v20 = vld [vmem:[#allocation2 + $0x2a8] sm:$0xff] }
 0x116   :  { %v849_v50 = vmul.f32 %v2023_v6, %v3155_v5  ;;  %v851_v54 = vmul.f32 %v2024_v20, %v3143_v23  ;;  %v2025_v46 = vld [vmem:[#allocation2 + $0x2b8] sm:$0xff]  ;;  %v2026_v27 = vld [vmem:[#allocation2 + $0x2c8] sm:$0xff]  ;;  %v873_v6 = vadd.f32 %v3174_v0, %v3158_v17  ;;  %v895_v23 = vadd.f32 %v3196_v59, %v3192_v42 }
 0x117   :  { %v853_v45 = vmul.f32 %v2025_v46, %v3145_v30  ;;  %v855_v37 = vmul.f32 %v2026_v27, %v3148_v49  ;;  %v2027_v32 = vld [vmem:[#allocation2 + $0x2d8] sm:$0xff]  ;;  %v2028_v8 = vld [vmem:[#allocation2 + $0x2e8] sm:$0xff]  ;;  %v917_v30 = vadd.f32 %v3216_v34, %v3212_v52  ;;  %v939_v49 = vadd.f32 %v3234_v31, %v3231_v9 }
 0x118   :  { %v857_v47 = vmul.f32 %v2027_v32, %v3150_v10  ;;  %v859_v24 = vmul.f32 %v2028_v8, %v3152_v40  ;;  %v2029_v15 = vld [vmem:[#allocation2 + $0x2f8] sm:$0xff]  ;;  %v961_v20 = vadd.f32 %v817_v16, %v815_v4  ;;  %v983_v10 = vadd.f32 %v829_v33, %v827_v25 }
 0x119   :  { %v861_v3 = vmul.f32 %v2029_v15, %v3155_v5  ;;  %v1005_v46 = vadd.f32 %v841_v61, %v839_v53  ;;  %v874_v40 = vadd.f32 %v873_v6, %v3178_v11  ;;  %v896_v27 = vadd.f32 %v895_v23, %v3199_v44 }
 0x11a   :  { %v918_v5 = vadd.f32 %v917_v30, %v3219_v51  ;;  %v1027_v15 = vadd.f32 %v853_v45, %v851_v54  ;;  %v940_v17 = vadd.f32 %v939_v49, %v3237_v2  ;;  %v962_v0 = vadd.f32 %v961_v20, %v819_v63 }
 0x11b   :  { %v984_v42 = vadd.f32 %v983_v10, %v831_v41  ;;  %v1006_v59 = vadd.f32 %v1005_v46, %v843_v39  ;;  %v875_v52 = vadd.f32 %v874_v40, %v3181_v57  ;;  %v897_v34 = vadd.f32 %v896_v27, %v3202_v22 }
 0x11c   :  { %v919_v9 = vadd.f32 %v918_v5, %v3222_v35  ;;  %v1028_v31 = vadd.f32 %v1027_v15, %v855_v37  ;;  %v941_v4 = vadd.f32 %v940_v17, %v3240_v48  ;;  %v963_v11 = vadd.f32 %v962_v0, %v3252_v43  ;;  %v1329_v15 = vld [vmem:[#allocation7 + $0x290] sm:$0xff]  ;;  %v1330_v17 = vld [vmem:[#allocation7 + $0x298] sm:$0xff] }
 0x11d   :  { %v985_v44 = vadd.f32 %v984_v42, %v833_v12  ;;  %v1007_v16 = vadd.f32 %v1006_v59, %v845_v28  ;;  %v876_v51 = vadd.f32 %v875_v52, %v3184_v14  ;;  %v898_v2 = vadd.f32 %v897_v34, %v3206_v38  ;;  %v1313_v34 = vld [vmem:[#allocation7 + $0x210] sm:$0xff] }
 0x11e   :  { %v920_v63 = vadd.f32 %v919_v9, %v3225_v36  ;;  %v1029_v25 = vadd.f32 %v1028_v31, %v857_v47  ;;  %v942_v57 = vadd.f32 %v941_v4, %v3243_v21  ;;  %v964_v22 = vadd.f32 %v963_v11, %v3255_v55  ;;  %v1314_v9 = vld [vmem:[#allocation7 + $0x218] sm:$0xff]  ;;  %v1331_v31 = vld [vmem:[#allocation7 + $0x2a0] sm:$0xff]  ;;  %v1332_v4 = vld [vmem:[#allocation7 + $0x2a8] sm:$0xff] }
 0x11f   :  { %v986_v33 = vadd.f32 %v985_v44, %v835_v1  ;;  %v1008_v35 = vadd.f32 %v1007_v16, %v847_v19  ;;  %v877_v41 = vadd.f32 %v876_v51, %v3189_v18  ;;  %v899_v48 = vadd.f32 %v898_v2, %v3209_v26  ;;  %v3308_v11 = vld [vmem:[#allocation7 + $0x220] sm:$0xff]  ;;  %v3310_v44 = vld [vmem:[#allocation7 + $0x228] sm:$0xff] }
 0x120   :  { %v921_v43 = vadd.f32 %v920_v63, %v3228_v13  ;;  %v1030_v12 = vadd.f32 %v1029_v25, %v859_v24  ;;  %v943_v14 = vadd.f32 %v942_v57, %v3246_v56  ;;  %v965_v38 = vadd.f32 %v964_v22, %v3258_v29  ;;  %v3312_v25 = vld [vmem:[#allocation7 + $0x2b0] sm:$0xff]  ;;  %v3314_v57 = vld [vmem:[#allocation7 + $0x2b8] sm:$0xff] }
 0x121   :  { %v987_v36 = vadd.f32 %v986_v33, %v3266_v62  ;;  %v1009_v53 = vadd.f32 %v1008_v35, %v849_v50  ;;  %v878_v61 = vrot.slane %v877_v41, 4  ;;  %v900_v21 = vrot.slane %v899_v48, 4 }
 0x122   :  { %v922_v39 = vrot.slane %v921_v43, 4  ;;  %v1031_v55 = vadd.f32 %v1030_v12, %v861_v3  ;;  %v944_v1 = vrot.slane %v943_v14, 4  ;;  %v966_v28 = vrot.slane %v965_v38, 4  ;;  %v3320_v12 = vld [vmem:[#allocation7 + $0x2c0] sm:$0xff] }
 0x123   :  { %v988_v19 = vrot.slane %v987_v36, 4  ;;  %v1010_v18 = vrot.slane %v1009_v53, 4  ;;  %v879_v54 = vadd.f32 %v878_v61, %v877_v41  ;;  %v901_v26 = vadd.f32 %v900_v21, %v899_v48  ;;  %v3316_v48 = vld [vmem:[#allocation7 + $0x230] sm:$0xff]  ;;  %v3324_v21 = vld [vmem:[#allocation7 + $0x240] sm:$0xff] }
 0x124   :  { %v923_v45 = vadd.f32 %v922_v39, %v921_v43  ;;  %v1032_v13 = vrot.slane %v1031_v55, 4  ;;  %v945_v37 = vadd.f32 %v944_v1, %v943_v14  ;;  %v967_v32 = vadd.f32 %v966_v28, %v965_v38  ;;  %v3318_v43 = vld [vmem:[#allocation7 + $0x238] sm:$0xff]  ;;  %v3322_v14 = vld [vmem:[#allocation7 + $0x2c8] sm:$0xff] }
 0x125   :  { %v989_v56 = vadd.f32 %v988_v19, %v987_v36  ;;  %v1011_v47 = vadd.f32 %v1010_v18, %v1009_v53  ;;  %v880_v29 = vrot.slane %v879_v54, 2  ;;  %v902_v8 = vrot.slane %v901_v26, 2  ;;  %v3326_v39 = vld [vmem:[#allocation7 + $0x248] sm:$0xff] }
 0x126   :  { %v924_v62 = vrot.slane %v923_v45, 2  ;;  %v1033_v50 = vadd.f32 %v1032_v13, %v1031_v55  ;;  %v946_v24 = vrot.slane %v945_v37, 2  ;;  %v968_v6 = vrot.slane %v967_v32, 2  ;;  %v3328_v55 = vld [vmem:[#allocation7 + $0x2d0] sm:$0xff] }
 0x127   :  { %v990_v23 = vrot.slane %v989_v56, 2  ;;  %v1012_v3 = vrot.slane %v1011_v47, 2  ;;  %v881_v30 = vadd.f32 %v880_v29, %v879_v54  ;;  %v903_v49 = vadd.f32 %v902_v8, %v901_v26  ;;  %v3332_v54 = vld [vmem:[#allocation7 + $0x2d8] sm:$0xff]  ;;  %v3334_v26 = vld [vmem:[#allocation7 + $0x250] sm:$0xff]  ;;  %v3343_v29 = vld [vmem:[#allocation7 + $0x2e8] sm:$0xff] }
 0x128   :  { %v925_v20 = vadd.f32 %v924_v62, %v923_v45  ;;  %v1034_v10 = vrot.slane %v1033_v50, 2  ;;  %v947_v46 = vadd.f32 %v946_v24, %v945_v37  ;;  %v969_v40 = vadd.f32 %v968_v6, %v967_v32  ;;  %v3336_v45 = vld [vmem:[#allocation7 + $0x258] sm:$0xff]  ;;  %v3345_v8 = vld [vmem:[#allocation7 + $0x260] sm:$0xff] }
 0x129   :  { %v991_v27 = vadd.f32 %v990_v23, %v989_v56  ;;  %v1013_v5 = vadd.f32 %v1012_v3, %v1011_v47  ;;  %v882_v0 = vrot.slane %v881_v30, 1  ;;  %v904_v42 = vrot.slane %v903_v49, 1  ;;  %v3341_v47 = vld [vmem:[#allocation7 + $0x2e0] sm:$0xff]  ;;  %v3354_v3 = vld [vmem:[#allocation7 + $0x268] sm:$0xff] }
 0x12a   :  { %v926_v59 = vrot.slane %v925_v20, 1  ;;  %v1035_v52 = vadd.f32 %v1034_v10, %v1033_v50  ;;  %v948_v16 = vrot.slane %v947_v46, 1  ;;  %v970_v51 = vrot.slane %v969_v40, 1  ;;  %v3347_v62 = vld [vmem:[#allocation5 + $0xc0] sm:$0xff] }
 0x12b   :  { %v992_v2 = vrot.slane %v991_v27, 1  ;;  %v1014_v63 = vrot.slane %v1013_v5, 1  ;;  %v883_v22 = vadd.f32 %v882_v0, %v881_v30  ;;  %v905_v33 = vadd.f32 %v904_v42, %v903_v49  ;;  %v3356_v30 = vld [vmem:[#allocation7 + $0x2f0] sm:$0xff]  ;;  %v3358_v49 = vld [vmem:[#allocation7 + $0x2f8] sm:$0xff]  ;;  %v3946_v0 = vld [vmem:[#allocation70_spill] sm:$0xff] }
 0x12c   :  { %v927_v35 = vadd.f32 %v926_v59, %v925_v20  ;;  %v1036_v41 = vrot.slane %v1035_v52, 1  ;;  %v949_v38 = vadd.f32 %v948_v16, %v947_v46  ;;  %v971_v36 = vadd.f32 %v970_v51, %v969_v40  ;;  %v3392_v51 = vld [vmem:[#allocation5 + $0x110] sm:$0xff]  ;;  %v2056_v16 = vld [vmem:[#allocation2 + $0x1a0] sm:$0xff] }
 0x12d   :  { %v993_v53 = vadd.f32 %v992_v2, %v991_v27  ;;  %v1015_v61 = vadd.f32 %v1014_v63, %v1013_v5  ;;  %v1132_v28 = vsel %vm1054_vm0, %v905_v33, %v883_v22  ;;  %v1171_v19 = vsub.s32 5, %v3941_v60  ;;  %v3367_v27 = vld [vmem:[#allocation7 + $0x270] sm:$0xff]  ;;  %v3369_v5 = vld [vmem:[#allocation7 + $0x278] sm:$0xff] }
 0x12e   :  { %v1037_v1 = vadd.f32 %v1036_v41, %v1035_v52  ;;  %v1910_v18 = vpack.c.bf16 %v1330_v17, %v1329_v15  ;;  %v1133_v13 = vsel %vm1056_vm1, %v927_v35, %v1132_v28  ;;  %v1912_v37 = vpack.c.bf16 %v1314_v9, %v1313_v34  ;;  %3945 = vst [vmem:[#allocation16_spill] sm:$0xff] %v3367_v27  ;;  %v3371_v15 = vld [vmem:[#allocation5 + $0xd0] sm:$0xff]  ;;  %v3379_v34 = vld [vmem:[#allocation5 + $0xe0] sm:$0xff] }
 0x12f   :  { %v1914_v32 = vpack.c.bf16 %v1332_v4, %v1331_v31  ;;  %v1916_v56 = vpack.c.bf16 %v3310_v44, %v3308_v11  ;;  %v1134_v50 = vsel %vm1058_vm2, %v949_v38, %v1133_v13  ;;  %v1172_v24 = vrot.slane %v3164_v58, %v1171_v19  ;;  %v3381_v9 = vld [vmem:[#allocation5 + $0xf0] sm:$0xff]  ;;  %v3383_v31 = vld [vmem:[#allocation5 + $0x100] sm:$0xff] }
 0x130   :  { %v1216_v6 = vrot.slane %v3170_v7, %v1171_v19  ;;  %1911 = vmatprep.subr.bf16.mxu0 %v1910_v18  ;;  %v1918_v23 = vpack.c.bf16 %v3314_v57, %v3312_v25  ;;  %v1135_v20 = vsel %vm1060_vm3, %v971_v36, %v1134_v50  ;;  %v1920_v10 = vpack.c.bf16 %v3318_v43, %v3316_v48  ;;  %v2030_v25 = vld [vmem:[#allocation2] sm:$0xff]  ;;  %v2031_v22 = vld [vmem:[#allocation2 + $0x10] sm:$0xff] }
 0x131   :  { %1913 = vmatpush3.bf16.msra.mxu0 %v1912_v37  ;;  %v1922_v46 = vpack.c.bf16 %v3322_v14, %v3320_v12  ;;  %v1924_v40 = vpack.c.bf16 %v3326_v39, %v3324_v21  ;;  %v1136_v17 = vsel %vm1062_vm4, %v993_v53, %v1135_v20  ;;  %v1184_v42 = vmul.f32 %v1172_v24, %v3946_v0  ;;  %v2032_v41 = vld [vmem:[#allocation2 + $0x20] sm:$0xff]  ;;  %v2033_v43 = vld [vmem:[#allocation2 + $0x30] sm:$0xff] }
 0x132   :  { %1915 = vmatprep.subr.bf16.mxu0 %v1914_v32  ;;  %v1926_v59 = vpack.c.bf16 %v3332_v54, %v3328_v55  ;;  %v1137_v4 = vsel %vm1064_vm5, %v1015_v61, %v1136_v17  ;;  %v3398_v57 = vmul.f32 %v2030_v25, %v3347_v62  ;;  %v3401_v33 = vmul.f32 %v2031_v22, %v3371_v15  ;;  %v2034_v36 = vld [vmem:[#allocation2 + $0x40] sm:$0xff]  ;;  %v2035_v61 = vld [vmem:[#allocation2 + $0x50] sm:$0xff] }
 0x133   :  { %v1138_v2 = vsel %vm1066_vm6, %v1037_v1, %v1137_v4  ;;  %v3404_v48 = vmul.f32 %v2032_v41, %v3379_v34  ;;  %v3407_v38 = vmul.f32 %v2033_v43, %v3381_v9  ;;  %v3410_v53 = vmul.f32 %v2034_v36, %v3383_v31  ;;  %v2036_v28 = vld [vmem:[#allocation2 + $0x60] sm:$0xff]  ;;  %v2037_v18 = vld [vmem:[#allocation2 + $0x70] sm:$0xff] }
 0x134   :  { %v1190_v35 = vadd.f32 %v1184_v42, %v1138_v2  ;;  %v3413_v1 = vmul.f32 %v2035_v61, %v3392_v51  ;;  %v3416_v19 = vmul.f32 %v2036_v28, %v3347_v62  ;;  %v3419_v13 = vmul.f32 %v2037_v18, %v3371_v15  ;;  %v2038_v37 = vld [vmem:[#allocation2 + $0x80] sm:$0xff]  ;;  %v2039_v50 = vld [vmem:[#allocation2 + $0x90] sm:$0xff] }
 0x135   :  { %1917 = vmatpush3.bf16.msra.mxu0 %v1916_v56  ;;  %v3422_v32 = vmul.f32 %v2038_v37, %v3379_v34  ;;  %v3425_v24 = vmul.f32 %v2039_v50, %v3381_v9  ;;  %v2041_v17 = vld [vmem:[#allocation2 + $0xb0] sm:$0xff]  ;;  %v2042_v4 = vld [vmem:[#allocation2 + $0xc0] sm:$0xff] }
 0x136   :  { %1919 = vmatprep.subr.bf16.mxu0 %v1918_v23  ;;  %3947 = vst [vmem:[#allocation67_spill] sm:$0xff] %v3413_v1  ;;  %v1228_v56 = vadd.f32 %v1216_v6, %v1190_v35  ;;  %v2040_v23 = vld [vmem:[#allocation2 + $0xa0] sm:$0xff]  ;;  %v3431_v42 = vmul.f32 %v2041_v17, %v3392_v51  ;;  %v3434_v2 = vmul.f32 %v2042_v4, %v3347_v62  ;;  %v2043_v25 = vld [vmem:[#allocation2 + $0xd0] sm:$0xff] }
 0x137   :  { %v3428_v20 = vmul.f32 %v2040_v23, %v3383_v31  ;;  %v3437_v22 = vmul.f32 %v2043_v25, %v3371_v15  ;;  %v2044_v6 = vld [vmem:[#allocation2 + $0xe0] sm:$0xff]  ;;  %v2045_v41 = vld [vmem:[#allocation2 + $0xf0] sm:$0xff] }
 0x138   :  { %3948 = vst [vmem:[#allocation23_spill] sm:$0xff] %v3431_v42  ;;  %v3440_v35 = vmul.f32 %v2044_v6, %v3379_v34  ;;  %v3443_v43 = vmul.f32 %v2045_v41, %v3381_v9  ;;  %vm1234_vm11 = vcmp.gt.f32.partialorder %v1228_v56, 0.0  ;;  %v1240_v36 = vmul.f32 0.01, %v1228_v56  ;;  %v2046_v61 = vld [vmem:[#allocation2 + $0x100] sm:$0xff]  ;;  %v2047_v18 = vld [vmem:[#allocation2 + $0x110] sm:$0xff] }
 0x139   :  { %1921 = vmatpush3.bf16.msra.mxu0 %v1920_v10  ;;  %v3446_v28 = vmul.f32 %v2046_v61, %v3383_v31  ;;  %v3449_v37 = vmul.f32 %v2047_v18, %v3392_v51  ;;  %v2048_v50 = vld [vmem:[#allocation2 + $0x120] sm:$0xff]  ;;  %v2049_v17 = vld [vmem:[#allocation2 + $0x130] sm:$0xff] }
 0x13a   :  { %1923 = vmatprep.subr.bf16.mxu0 %v1922_v46  ;;  %v3455_v23 = vmul.f32 %v2048_v50, %v3347_v62  ;;  %v3458_v4 = vmul.f32 %v2049_v17, %v3371_v15  ;;  %v2050_v10 = vld [vmem:[#allocation2 + $0x140] sm:$0xff]  ;;  %v2051_v6 = vld [vmem:[#allocation2 + $0x150] sm:$0xff]  ;;  %v1246_v61 = vsel %vm1234_vm11, %v1228_v56, %v1240_v36 }
 0x13b   :  { %3949 = vst [vmem:[#allocation24_spill] sm:$0xff] %v3449_v37  ;;  %v3461_v25 = vmul.f32 %v2050_v10, %v3379_v34  ;;  %v3464_v41 = vmul.f32 %v2051_v6, %v3381_v9  ;;  %v2052_v12 = vld [vmem:[#allocation2 + $0x160] sm:$0xff]  ;;  %v2053_v46 = vld [vmem:[#allocation2 + $0x170] sm:$0xff]  ;;  %1554 = vmatprep.mubr.f32.mxu0 %v1246_v61  ;;  %v818_v6 = vmul.f32 %v2056_v16, %v3379_v34 }
 0x13c   :  { %v3468_v14 = vmul.f32 %v2052_v12, %v3383_v31  ;;  %v3471_v18 = vmul.f32 %v2053_v46, %v3392_v51  ;;  %v2054_v50 = vld [vmem:[#allocation2 + $0x180] sm:$0xff]  ;;  %v2055_v10 = vld [vmem:[#allocation2 + $0x190] sm:$0xff] }
 0x13d   :  { %v814_v17 = vmul.f32 %v2054_v50, %v3347_v62  ;;  %v816_v63 = vmul.f32 %v2055_v10, %v3371_v15  ;;  %v2057_v44 = vld [vmem:[#allocation2 + $0x1b0] sm:$0xff]  ;;  %v2058_v36 = vld [vmem:[#allocation2 + $0x1c0] sm:$0xff]  ;;  %1925 = vmatpush3.bf16.msra.mxu0 %v1924_v40 }
 0x13e   :  { %3950 = vst [vmem:[#allocation25_spill] sm:$0xff] %v3471_v18  ;;  %v3477_v56 = vmul.f32 %v2057_v44, %v3381_v9  ;;  %v3480_v12 = vmul.f32 %v2058_v36, %v3383_v31  ;;  %v2059_v46 = vld [vmem:[#allocation2 + $0x1d0] sm:$0xff]  ;;  %v2060_v50 = vld [vmem:[#allocation2 + $0x1e0] sm:$0xff]  ;;  %1927 = vmatprep.subr.bf16.mxu0 %v1926_v59 }
 0x13f   :  { %v3486_v61 = vmul.f32 %v2059_v46, %v3392_v51  ;;  %v826_v10 = vmul.f32 %v2060_v50, %v3347_v62  ;;  %v2061_v16 = vld [vmem:[#allocation2 + $0x1f0] sm:$0xff]  ;;  %v2062_v44 = vld [vmem:[#allocation2 + $0x200] sm:$0xff] }
 0x140   :  { %v828_v11 = vmul.f32 %v2061_v16, %v3371_v15  ;;  %v830_v52 = vmul.f32 %v2062_v44, %v3379_v34  ;;  %v2063_v36 = vld [vmem:[#allocation2 + $0x210] sm:$0xff]  ;;  %v2064_v39 = vld [vmem:[#allocation2 + $0x220] sm:$0xff] }
 0x141   :  { %3951 = vst [vmem:[#allocation26_spill] sm:$0xff] %v3486_v61  ;;  %v832_v21 = vmul.f32 %v2063_v36, %v3381_v9  ;;  %v834_v40 = vmul.f32 %v2064_v39, %v3383_v31  ;;  %v2065_v46 = vld [vmem:[#allocation2 + $0x230] sm:$0xff]  ;;  %v2066_v50 = vld [vmem:[#allocation2 + $0x240] sm:$0xff] }
 0x142   :  { %v3497_v7 = vmul.f32 %v2065_v46, %v3392_v51  ;;  %v838_v16 = vmul.f32 %v2066_v50, %v3347_v62  ;;  %v2067_v0 = vld [vmem:[#allocation2 + $0x250] sm:$0xff]  ;;  %v2068_v58 = vld [vmem:[#allocation2 + $0x260] sm:$0xff] }
 0x143   :  { %v840_v44 = vmul.f32 %v2067_v0, %v3371_v15  ;;  %v842_v55 = vmul.f32 %v2068_v58, %v3379_v34  ;;  %v2069_v54 = vld [vmem:[#allocation2 + $0x270] sm:$0xff]  ;;  %v2070_v36 = vld [vmem:[#allocation2 + $0x280] sm:$0xff]  ;;  %v3953_v58 = vpack.c.bf16 %v3336_v45, %v3334_v26  ;;  %v884_v26 = vadd.f32 %v3419_v13, %v3416_v19 }
 0x144   :  { %3952 = vst [vmem:[#allocation27_spill] sm:$0xff] %v3497_v7  ;;  %v844_v59 = vmul.f32 %v2069_v54, %v3381_v9  ;;  %v846_v60 = vmul.f32 %v2070_v36, %v3383_v31  ;;  %v2071_v39 = vld [vmem:[#allocation2 + $0x290] sm:$0xff]  ;;  %v2072_v46 = vld [vmem:[#allocation2 + $0x2a0] sm:$0xff]  ;;  %v906_v45 = vadd.f32 %v3437_v22, %v3434_v2  ;;  %v3955_v19 = vpack.c.bf16 %v3354_v3, %v3345_v8 }
 0x145   :  { %v848_v61 = vmul.f32 %v2071_v39, %v3392_v51  ;;  %v850_v7 = vmul.f32 %v2072_v46, %v3347_v62  ;;  %v2073_v18 = vld [vmem:[#allocation2 + $0x2b0] sm:$0xff]  ;;  %v2074_v37 = vld [vmem:[#allocation2 + $0x2c0] sm:$0xff]  ;;  %1929 = vmatpush3.bf16.msra.mxu0 %v3953_v58  ;;  %v862_v62 = vadd.f32 %v3401_v33, %v3398_v57  ;;  %v885_v57 = vadd.f32 %v884_v26, %v3422_v32 }
 0x146   :  { %v852_v50 = vmul.f32 %v2073_v18, %v3371_v15  ;;  %v854_v0 = vmul.f32 %v2074_v37, %v3379_v34  ;;  %v2075_v54 = vld [vmem:[#allocation2 + $0x2d0] sm:$0xff]  ;;  %v2076_v36 = vld [vmem:[#allocation2 + $0x2e0] sm:$0xff]  ;;  %v3954_v15 = vpack.c.bf16 %v3343_v29, %v3341_v47  ;;  %v928_v34 = vadd.f32 %v3458_v4, %v3455_v23 }
 0x147   :  { %v856_v42 = vmul.f32 %v2075_v54, %v3381_v9  ;;  %v858_v1 = vmul.f32 %v2076_v36, %v3383_v31  ;;  %v2077_v39 = vld [vmem:[#allocation2 + $0x2f0] sm:$0xff]  ;;  %v950_v9 = vadd.f32 %v816_v63, %v814_v17  ;;  %v863_v31 = vadd.f32 %v862_v62, %v3404_v48 }
 0x148   :  { %v860_v27 = vmul.f32 %v2077_v39, %v3392_v51  ;;  %1931 = vmatprep.subr.bf16.mxu0 %v3954_v15  ;;  %v972_v51 = vadd.f32 %v828_v11, %v826_v10  ;;  %v994_v37 = vadd.f32 %v840_v44, %v838_v16  ;;  %v1016_v18 = vadd.f32 %v852_v50, %v850_v7 }
 0x149   :  { %v907_v47 = vadd.f32 %v906_v45, %v3440_v35  ;;  %v929_v29 = vadd.f32 %v928_v34, %v3461_v25  ;;  %v951_v33 = vadd.f32 %v950_v9, %v818_v6  ;;  %1933 = vmatpush3.bf16.msra.mxu0 %v3955_v19  ;;  %v864_v13 = vadd.f32 %v863_v31, %v3407_v38  ;;  %v3959_v25 = vld [vmem:[#allocation67_spill] sm:$0xff] }
 0x14a   :  { %v973_v2 = vadd.f32 %v972_v51, %v830_v52  ;;  %v995_v63 = vadd.f32 %v994_v37, %v842_v55  ;;  %v1017_v22 = vadd.f32 %v1016_v18, %v854_v0  ;;  %v3956_v11 = vpack.c.bf16 %v3358_v49, %v3356_v30 }
 0x14b   :  { %v886_v7 = vadd.f32 %v885_v57, %v3425_v24  ;;  %v908_v48 = vadd.f32 %v907_v47, %v3443_v43  ;;  %v930_v32 = vadd.f32 %v929_v29, %v3464_v41  ;;  %v952_v35 = vadd.f32 %v951_v33, %v3477_v56  ;;  %v3957_v24 = vld [vmem:[#allocation16_spill] sm:$0xff]  ;;  %v3960_v56 = vld [vmem:[#allocation23_spill] sm:$0xff] }
 0x14c   :  { %1935 = vmatprep.subr.bf16.mxu0 %v3956_v11  ;;  %v865_v8 = vadd.f32 %v864_v13, %v3410_v53  ;;  %v974_v3 = vadd.f32 %v973_v2, %v832_v21  ;;  %v996_v23 = vadd.f32 %v995_v63, %v844_v59  ;;  %v1018_v38 = vadd.f32 %v1017_v22, %v856_v42  ;;  %v3961_v42 = vld [vmem:[#allocation24_spill] sm:$0xff]  ;;  %v3964_v55 = vld [vmem:[#allocation27_spill] sm:$0xff] }
 0x14d   :  { %v887_v52 = vadd.f32 %v886_v7, %v3428_v20  ;;  %v909_v4 = vadd.f32 %v908_v48, %v3446_v28  ;;  %v931_v30 = vadd.f32 %v930_v32, %v3468_v14  ;;  %v953_v49 = vadd.f32 %v952_v35, %v3480_v12  ;;  %v3962_v20 = vld [vmem:[#allocation25_spill] sm:$0xff]  ;;  %v3963_v28 = vld [vmem:[#allocation26_spill] sm:$0xff] }
 0x14e   :  { %v3958_v43 = vpack.c.bf16 %v3369_v5, %v3957_v24  ;;  %v866_v41 = vadd.f32 %v865_v8, %v3959_v25  ;;  %v975_v17 = vadd.f32 %v974_v3, %v834_v40  ;;  %v997_v6 = vadd.f32 %v996_v23, %v846_v60 }
 0x14f   :  { %v1019_v53 = vadd.f32 %v1018_v38, %v858_v1  ;;  %v888_v10 = vadd.f32 %v887_v52, %v3960_v56  ;;  %v910_v21 = vadd.f32 %v909_v4, %v3961_v42  ;;  %v932_v16 = vadd.f32 %v931_v30, %v3962_v20 }
 0x150   :  { %1937 = vmatpush3.bf16.msra.mxu0 %v3958_v43  ;;  %v954_v44 = vadd.f32 %v953_v49, %v3963_v28  ;;  %v867_v14 = vrot.slane %v866_v41, 4  ;;  %v976_v12 = vadd.f32 %v975_v17, %v3964_v55  ;;  %v998_v59 = vadd.f32 %v997_v6, %v848_v61  ;;  %v3965_v49 = vld [vmem:[#allocation15_spill] sm:$0xff]  ;;  %v3967_v43 = vld [vmem:[#allocation21_spill] sm:$0xff]  ;;  %v3970_v55 = vld [vmem:[#allocation68_spill] sm:$0xff] }
 0x151   :  { %v1020_v46 = vadd.f32 %v1019_v53, %v860_v27  ;;  %v889_v5 = vrot.slane %v888_v10, 4  ;;  %v911_v50 = vrot.slane %v910_v21, 4  ;;  %v933_v0 = vrot.slane %v932_v16, 4 }
 0x152   :  { %v955_v58 = vrot.slane %v954_v44, 4  ;;  %v868_v40 = vadd.f32 %v867_v14, %v866_v41  ;;  %v977_v60 = vrot.slane %v976_v12, 4  ;;  %v999_v1 = vrot.slane %v998_v59, 4 }
 0x153   :  { %v1021_v54 = vrot.slane %v1020_v46, 4  ;;  %v890_v36 = vadd.f32 %v889_v5, %v888_v10  ;;  %v912_v39 = vadd.f32 %v911_v50, %v910_v21  ;;  %v934_v62 = vadd.f32 %v933_v0, %v932_v16  ;;  %v3968_v21 = vld [vmem:[#allocation70_spill] sm:$0xff] }
 0x154   :  { %v956_v15 = vadd.f32 %v955_v58, %v954_v44  ;;  %v869_v26 = vrot.slane %v868_v40, 2  ;;  %v978_v45 = vadd.f32 %v977_v60, %v976_v12  ;;  %v1000_v34 = vadd.f32 %v999_v1, %v998_v59  ;;  %v1563_v58 = vld [vmem:[#allocation8] sm:$0xff]  ;;  %v1565_v60 = vld [vmem:[#allocation8 + $0x10] sm:$0xff] }
 0x155   :  { %v1022_v9 = vadd.f32 %v1021_v54, %v1020_v46  ;;  %v891_v31 = vrot.slane %v890_v36, 2  ;;  %v913_v51 = vrot.slane %v912_v39, 2  ;;  %v935_v61 = vrot.slane %v934_v62, 2 }
 0x156   :  { %v957_v27 = vrot.slane %v956_v15, 2  ;;  %v870_v37 = vadd.f32 %v869_v26, %v868_v40  ;;  %v979_v18 = vrot.slane %v978_v45, 2  ;;  %v1001_v57 = vrot.slane %v1000_v34, 2  ;;  %v1564_v40 = vld [vmem:[#allocation8 + $0x8] sm:$0xff] }
 0x157   :  { %v1023_v47 = vrot.slane %v1022_v9, 2  ;;  %v892_v29 = vadd.f32 %v891_v31, %v890_v36  ;;  %v914_v33 = vadd.f32 %v913_v51, %v912_v39  ;;  %v936_v19 = vadd.f32 %v935_v61, %v934_v62  ;;  %v1566_v36 = vld [vmem:[#allocation8 + $0x18] sm:$0xff]  ;;  %v1567_v62 = vld [vmem:[#allocation8 + $0x20] sm:$0xff]  ;;  %v1572_v51 = vld [vmem:[#allocation8 + $0x48] sm:$0xff] }
 0x158   :  { %v958_v13 = vadd.f32 %v957_v27, %v956_v15  ;;  %v871_v2 = vrot.slane %v870_v37, 1  ;;  %v980_v63 = vadd.f32 %v979_v18, %v978_v45  ;;  %v1002_v22 = vadd.f32 %v1001_v57, %v1000_v34  ;;  %v1568_v15 = vld [vmem:[#allocation8 + $0x28] sm:$0xff]  ;;  %v1569_v45 = vld [vmem:[#allocation8 + $0x30] sm:$0xff]  ;;  %v1570_v34 = vld [vmem:[#allocation8 + $0x38] sm:$0xff] }
 0x159   :  { %v1024_v11 = vadd.f32 %v1023_v47, %v1022_v9  ;;  %v893_v7 = vrot.slane %v892_v29, 1  ;;  %v915_v48 = vrot.slane %v914_v33, 1  ;;  %v937_v32 = vrot.slane %v936_v19, 1  ;;  %v1571_v31 = vld [vmem:[#allocation8 + $0x40] sm:$0xff]  ;;  %v1573_v27 = vld [vmem:[#allocation8 + $0x50] sm:$0xff]  ;;  %v1576_v47 = vld [vmem:[#allocation8 + $0x68] sm:$0xff] }
 0x15a   :  { %v959_v35 = vrot.slane %v958_v13, 1  ;;  %v872_v8 = vadd.f32 %v871_v2, %v870_v37  ;;  %v981_v3 = vrot.slane %v980_v63, 1  ;;  %v1003_v23 = vrot.slane %v1002_v22, 1  ;;  %v1574_v37 = vld [vmem:[#allocation8 + $0x58] sm:$0xff]  ;;  %v1575_v57 = vld [vmem:[#allocation8 + $0x60] sm:$0xff] }
 0x15b   :  { %v894_v38 = vadd.f32 %v893_v7, %v892_v29  ;;  %v916_v52 = vadd.f32 %v915_v48, %v914_v33  ;;  %v938_v4 = vadd.f32 %v937_v32, %v936_v19  ;;  %v1025_v30 = vrot.slane %v1024_v11, 1  ;;  %v1577_v29 = vld [vmem:[#allocation8 + $0x70] sm:$0xff]  ;;  %v1578_v19 = vld [vmem:[#allocation8 + $0x78] sm:$0xff] }
 0x15c   :  { %v3966_v24 = vsub.s32 4, %v3965_v49  ;;  %v960_v41 = vadd.f32 %v959_v35, %v958_v13  ;;  %v982_v17 = vadd.f32 %v981_v3, %v980_v63  ;;  %v1004_v53 = vadd.f32 %v1003_v23, %v1002_v22  ;;  %v1683_v7 = vld [vmem:[%s3592_s6] ss:$0 sm:$0xff]  ;;  %s2208_s6 = smov [#allocation10]  }
 0x15d   :  { %v1125_v6 = vsel %vm1054_vm0, %v894_v38, %v872_v8  ;;  %v1026_v10 = vadd.f32 %v1025_v30, %v1024_v11  ;;  %v2205_v1 = vmov 0.0|0.0   ;;  %v1939_v54 = vpack.c.bf16 %v1564_v40, %v1563_v58  ;;  %s1672_s21 = sshll.u32 %s2208_s6, 4  ;;  %s1673_s21 = int_to_ptr.vmem [resolvable:$true] %s1672_s21 }
 0x15e   :  { %v1168_v25 = vrot.slane %v3967_v43, %v3966_v24  ;;  %v1126_v56 = vsel %vm1056_vm1, %v916_v52, %v1125_v6  ;;  %v3969_v14 = vmov %v3966_v24  ;;  %1938 = vmatprep.subr.bf16.mxu1 %v2205_v1  ;;  %v1942_v39 = vpack.c.bf16 %v1566_v36, %v1565_v60  ;;  %v1684_v24 = vld [vmem:[%s3594_s8] ss:$0 sm:$0xff]  ;;  %s2166_s22 = scalar_lea.vmem %s1673_s21, 128  ;;  %p2171_p5 = scmp.lt.s32.totalorder %s1673_s21, %s1673_s21 }
 0x15f   :  { %v1127_v42 = vsel %vm1058_vm2, %v938_v4, %v1126_v56  ;;  %v1212_v12 = vrot.slane %v3970_v55, %v3969_v14  ;;  %1940 = vmatpush3.bf16.msra.mxu1 %v1939_v54  ;;  %v1945_v26 = vpack.c.bf16 %v1568_v15, %v1567_v62  ;;  %v1948_v9 = vpack.c.bf16 %v1570_v34, %v1569_v45  ;;  %p2167_p4 = scmp.ne.s32.totalorder %s1673_s21, %s2166_s22  ;;  %p2172_p6 = scmp.lt.s32.totalorder %s2166_s22, %s2166_s22 }
 0x160   :  { %v1183_v20 = vmul.f32 %v1168_v25, %v3968_v21  ;;  %v1128_v16 = vsel %vm1060_vm3, %v960_v41, %v1127_v42  ;;  %1941 = vmatprep.subr.bf16.mxu1 %v2205_v1  ;;  %v1951_v61 = vpack.c.bf16 %v1572_v51, %v1571_v31  ;;  %v1954_v18 = vpack.c.bf16 %v1574_v37, %v1573_v27 }
 0x161   :  { %v1129_v28 = vsel %vm1062_vm4, %v982_v17, %v1128_v16  ;;  %v1957_v33 = vpack.c.bf16 %v1576_v47, %v1575_v57  ;;  %v2207_v13 = vmov 0.0   ;;  %v1960_v2 = vpack.c.bf16 %v1578_v19, %v1577_v29  ;;  %p2173_p7 = por %p2172_p6, %p2171_p5 }
 0x162   :  { %v1130_v44 = vsel %vm1064_vm5, %v1004_v53, %v1129_v28  ;;  %1839 = vmatprep.mubr.msk.f32.mxu1 %vm2206_vm13, %v2207_v13 }
 0x163   :  { %v1131_v59 = vsel %vm1066_vm6, %v1026_v10, %v1130_v44  ;;  %1943 = vmatpush3.bf16.msra.mxu1 %v1942_v39  ;;  %p2174_p8 = pnand %p2173_p7, %p2167_p4 }
 0x164   :  { %v1189_v46 = vadd.f32 %v1183_v20, %v1131_v59  ;;  %1944 = vmatprep.subr.bf16.mxu1 %v2205_v1 }
 0x166   :  { %v1227_v5 = vadd.f32 %v1212_v12, %v1189_v46 }
 0x167   :  { %1946 = vmatpush3.bf16.msra.mxu1 %v1945_v26 }
 0x168   :  { %vm1233_vm12 = vcmp.gt.f32.partialorder %v1227_v5, 0.0  ;;  %v1239_v50 = vmul.f32 0.01, %v1227_v5  ;;  %1947 = vmatprep.subr.bf16.mxu1 %v2205_v1 }
 0x16a   :  { %v1245_v0 = vsel %vm1233_vm12, %v1227_v5, %v1239_v50 }
 0x16b   :  { %1555 = vmatmul.mubr.f32.vlgmr.msra.gmra.mrb[2].mxu0 %v1245_v0  ;;  %1949 = vmatpush3.bf16.msra.mxu1 %v1948_v9 }
 0x16c   :  { %1950 = vmatprep.subr.bf16.mxu1 %v2205_v1 }
 0x16f   :  { %1952 = vmatpush3.bf16.msra.mxu1 %v1951_v61 }
 0x170   :  { %1953 = vmatprep.subr.bf16.mxu1 %v2205_v1 }
 0x173   :  { %1955 = vmatpush3.bf16.msra.mxu1 %v1954_v18 }
 0x174   :  { %1956 = vmatprep.subr.bf16.mxu1 %v2205_v1 }
 0x177   :  { %1958 = vmatpush3.bf16.msra.mxu1 %v1957_v33 }
 0x178   :  { %1959 = vmatprep.subr.bf16.mxu1 %v2205_v1 }
 0x17b   :  { %1961 = vmatpush3.bf16.msra.mxu1 %v1960_v2 }
 0x1c5   :  { %v1717_v63 = vpop.f32.mrb[0].mxu0 }
 0x1c6   :  { %v1718_v22 = vpop.f32.mrb[1].mxu0 }
 0x1c7   :  { %v1719_v11 = vadd.f32 %v1718_v22, %v1717_v63 }
 0x1c9   :  { %v1417_v32 = vadd.f32 %v1719_v11, %v1683_v7 }
 0x1e8   :  { %v1752_v48 = vpop.f32.mrb[0].mxu1 }
 0x1e9   :  { %v1753_v35 = vpop.f32.mrb[1].mxu1 }
 0x1ea   :  { %v1754_v8 = vadd.f32 %v1753_v35, %v1752_v48 }
 0x1ec   :  { %v1487_v3 = vadd.f32 %v1754_v8, %v1417_v32 }
 0x23e   :  { %v1787_v23 = vpop.f32.mrb[2].mxu0 }
 0x23f   :  { %v1788_v38 = vpop.f32.mrb[3].mxu0 }
 0x240   :  { %v1789_v52 = vadd.f32 %v1788_v38, %v1787_v23 }
 0x242   :  { %v1557_v4 = vadd.f32 %v1789_v52, %v1487_v3 }
 0x244   :  { %v1561_v30 = vmul.f32 0.01, %v1557_v4  ;;  %vm1560_vm14 = vcmp.gt.f32.partialorder %v1557_v4, 0.0 }
 0x246   :  { %v1562_v49 = vsel %vm1560_vm14, %v1557_v4, %v1561_v30 }
 0x247   :  { %1840 = vmatmul.mubr.f32.vlgmr.msra.gmra.mrb[2].mxu1 %v1562_v49 }
 0x31a   :  { %v1652_v43 = vpop.f32.mrb[2].mxu1 }
 0x31b   :  { %v1653_v25 = vadd.f32 %v1684_v24, %v1652_v43  ;;  %v1841_v41 = vpop.f32.mrb[3].mxu1 }
 0x31d   :  { %1656 = vmax.xlane.f32.xlu0 %v1653_v25 }
 0x3aa   :  { %v1657_v17 = vpop.xlane.xlu0 %1656 }
 0x3ab   :  { %v1658_v6 = vsub.f32 %v1653_v25, %v1657_v17 }
 0x3ad   :  { %v1659_v53 = vmul.f32 1.442695, %v1658_v6 }
 0x3af   :  { %1976 = vpow2.f32 %v1659_v53 }
 0x3b9   :  { %v1977_v56 = vpop.eup %1976 }
 0x3ba   :  { %1661 = vadd.xlane.f32.xlu1 %v1977_v56 }
 0x447   :  { %v1662_v10 = vpop.xlane.xlu1 %1661 }
 0x448   :  { %1978 = vrcp.f32 %v1662_v10 }
 0x452   :  { %v1979_v42 = vpop.eup %1978 }
 0x453   :  { %v1664_v21 = vmul.f32 %v1979_v42, %v1977_v56 }
 0x455   :  { %1665 = vst [vmem:[#allocation10] sm:$0xff] %v1664_v21 }
 0x456   :  { %2177 = shalt.err (!%p2174_p8)
}
 0x457   :  { %s2178_s27 = scalar_lea.hbm %s3595_s9, 128 }
 0x458   :  { %p2179_p9 = scmp.ne.s32.totalorder %s3595_s9, %s2178_s27  ;;  %p2182_p10 = scmp.lt.u32.totalorder %s2178_s27, %s3595_s9 }
 0x45a   :  { %p2184_p11 = pnand %p2182_p10, %p2179_p9 }
 0x45c   :  { %2187 = shalt.err (!%p2184_p11)
}
 0x45d   :  { %1675 = dma.vmem_to_hbm [thread:$0]  %s1673_s21, 128, %s3595_s9, [#allocation4]  }
 0x45e   :  { %2194 = dma.done.wait [#allocation4], 128  }
 0x45f   :  { %2195 = vsyncadd [#allocation4], 4294967168 }
 0x460   :  { %1679 = vsyncpa [#allocation3], 1 }
 0x461   :  { %1680 = vsyncpa [#allocation6], 1 }
 0x462   :  { %1681 = vsyncpa [#allocation9], 1 }
 0x463   :  { %1682 = vsyncpa [#allocation4], 1 }

</bundles_post_ra>
